<compile_context>
chip_gen: v7x
topology: tpu7x:2x2x1
jax: 0.10.0
libtpu: 0.0.40
codegen_flags: <defaults>
</compile_context>

<pallas_src>
import numpy as np
import jax
import jax.numpy as jnp
from jax.experimental import pallas as pl
from jax.experimental.pallas import tpu as pltpu

_COMPUTE_DTYPE = jnp.bfloat16


# ---------------------------------------------------------------------------
# Helpers
# ---------------------------------------------------------------------------
def _round_up(x, m):
    return (x + m - 1) // m * m


def _fold_bn(gamma, beta, mean, var, eps=1e-5):
    scale = gamma / jnp.sqrt(var + eps)
    shift = beta - mean * scale
    return scale, shift


def _pick_row_block(Ho, Wo, Cout):
    """Largest divisor rh of Ho such that rh*Wo output rows fit the target.

    Target rows adapt to Cout so the f32 accumulator stays ~<=2 MiB.
    """
    target_rows = max(512, min(4096, (2 << 20) // (4 * max(int(Cout), 1))))
    best = 1
    for d in range(1, Ho + 1):
        if Ho % d == 0 and d * Wo <= target_rows:
            best = d
    return best


# ---------------------------------------------------------------------------
# Fused 3x3 conv (+ folded BN shift + shortcut + ReLU) Pallas kernel
# ---------------------------------------------------------------------------
def _make_conv_kernel(*, s, rh, Wo, Ck, Cout, mode, Csc=0):
    """Kernel over grid (N, row_blocks).

    Inputs (refs, in order):
      x_ref     : (1, s, Hs, s, Ws, Ck)  phase-split padded image (resident)
      w_ref     : (9, Ck, Cout)          BN-scale-folded tap weights (resident)
      shift_ref : (1, Cout)              folded BN shift (f32, resident)
      [xs_ref   : (1, rh, Wo, Csc)]      strided input for projection shortcut
      [ws_ref   : (Csc, Cout)]           folded 1x1 shortcut weights
      [res_ref  : (1, rh, Wo, Cout)]     identity residual (bf16)
      o_ref     : (1, rh, Wo, Cout)
    """

    def kernel(*refs):
        x_ref, w_ref, shift_ref = refs[0], refs[1], refs[2]
        o_ref = refs[-1]
        r = pl.program_id(1)
        row0 = r * rh  # first output row of this block

        acc = jnp.zeros((rh * Wo, Cout), jnp.float32)
        for kh in range(3):
            # rows needed for tap row kh: s*(row0 + i) + kh, i in [0, rh)
            # -> row phase kh % s, contiguous rows row0 + kh//s .. + rh
            slab = x_ref[0, kh % s, pl.ds(row0 + kh // s, rh), :, :, :]
            # slab: (rh, s, Ws, Ck) -- both column phases of the needed rows
            for kw in range(3):
                xt = slab[:, kw % s, kw // s:kw // s + Wo, :]  # (rh, Wo, Ck)
                acc = acc + jnp.dot(xt.reshape(rh * Wo, Ck),
                                    w_ref[kh * 3 + kw],
                                    preferred_element_type=jnp.float32)

        acc = acc + shift_ref[...]  # folded BN shift (broadcast over rows)

        if mode == "proj":
            # projection shortcut fused as a second dot into the accumulator
            xs_ref, ws_ref = refs[3], refs[4]
            acc = acc + jnp.dot(xs_ref[0].reshape(rh * Wo, Csc),
                                ws_ref[...],
                                preferred_element_type=jnp.float32)
        elif mode == "identity":
            res_ref = refs[3]
            acc = acc + res_ref[0].astype(jnp.float32).reshape(rh * Wo, Cout)

        o_ref[0] = jnp.maximum(acc, 0.0).reshape(rh, Wo, Cout).astype(o_ref.dtype)

    return kernel


def _fused_conv3x3(x_nhwc, w9, shift, *, stride, residual=None, proj=None,
                   out_dtype=_COMPUTE_DTYPE):
    """relu( conv3x3_pad1(x) * bn_scale + bn_shift [+ shortcut] ).

    x_nhwc  : (N, H, W, Ck)   bf16
    w9      : (9, Ck, Cout)   bf16, BN scale already folded in
    shift   : (1, Cout)       f32 folded BN shift (shortcut shift included)
    residual: (N, Ho, Wo, Cout) bf16 identity residual, or None
    proj    : (xs (N,Ho,Wo,Csc) bf16, ws (Csc,Cout) bf16) projection shortcut
    """
    N, H, W, Ck = x_nhwc.shape
    Cout = w9.shape[-1]
    s = stride
    Ho = (H - 1) // s + 1
    Wo = (W - 1) // s + 1

    # Zero-pad (conv padding=1) and phase-split rows/cols by the stride so the
    # kernel only ever needs contiguous windows.  One cheap pass over x.
    Hp = _round_up(H + 2, s)
    Wp = _round_up(W + 2, s)
    xp = jnp.pad(x_nhwc, ((0, 0), (1, Hp - H - 1), (1, Wp - W - 1), (0, 0)))
    Hs, Ws = Hp // s, Wp // s
    xsplit = xp.reshape(N, Hs, s, Ws, s, Ck).transpose(0, 2, 1, 4, 3, 5)
    # xsplit[n, ph, i, pw, j, c] == xp[n, s*i+ph, s*j+pw, c]

    rh = _pick_row_block(Ho, Wo, Cout)
    R = Ho // rh

    inputs = [xsplit, w9, shift]
    in_specs = [
        # whole padded image per batch element, VMEM-resident across row blocks
        pl.BlockSpec((1, s, Hs, s, Ws, Ck), lambda n, r: (n, 0, 0, 0, 0, 0)),
        # folded tap weights, resident
        pl.BlockSpec((9, Ck, Cout), lambda n, r: (0, 0, 0)),
        # folded BN shift, resident
        pl.BlockSpec((1, Cout), lambda n, r: (0, 0)),
    ]
    mode, Csc = "plain", 0
    if proj is not None:
        xs, ws = proj
        Csc = xs.shape[-1]
        inputs += [xs, ws]
        in_specs += [
            pl.BlockSpec((1, rh, Wo, Csc), lambda n, r: (n, r, 0, 0)),
            pl.BlockSpec((Csc, Cout), lambda n, r: (0, 0)),
        ]
        mode = "proj"
    elif residual is not None:
        inputs += [residual]
        in_specs += [pl.BlockSpec((1, rh, Wo, Cout), lambda n, r: (n, r, 0, 0))]
        mode = "identity"

    kernel = _make_conv_kernel(s=s, rh=rh, Wo=Wo, Ck=Ck, Cout=Cout,
                               mode=mode, Csc=Csc)

    return pl.pallas_call(
        kernel,
        out_shape=jax.ShapeDtypeStruct((N, Ho, Wo, Cout), out_dtype),
        grid=(N, R),
        in_specs=in_specs,
        out_specs=pl.BlockSpec((1, rh, Wo, Cout), lambda n, r: (n, r, 0, 0)),
        compiler_params=pltpu.CompilerParams(
            dimension_semantics=("parallel", "parallel")),
    )(*inputs)


# ---------------------------------------------------------------------------
# BasicBlock forward (Pallas)
# ---------------------------------------------------------------------------
def basic_block_forward(x_nchw, params, stride, *, compute_dtype=_COMPUTE_DTYPE):
    x = jnp.transpose(x_nchw, (0, 2, 3, 1)).astype(compute_dtype)  # NHWC bf16
    N, H, W, Cin = x.shape
    planes = params["w1"].shape[0]
    s = stride
    Ho = (H - 1) // s + 1
    Wo = (W - 1) // s + 1

    # ---- conv1 (3x3, stride) + bn1 + relu ----
    s1, b1 = _fold_bn(*params["bn1"])
    # torch weight (Cout, Cin, kh, kw) -> (kh, kw, Cin, Cout) -> (9, Cin, Cout)
    w1 = (jnp.transpose(params["w1"], (2, 3, 1, 0)).reshape(9, Cin, planes)
          * s1[None, None, :]).astype(compute_dtype)
    out1 = _fused_conv3x3(x, w1, b1.reshape(1, planes).astype(jnp.float32),
                          stride=s, out_dtype=compute_dtype)

    # ---- conv2 (3x3, stride 1) + bn2 + shortcut + relu ----
    s2, b2 = _fold_bn(*params["bn2"])
    w2 = (jnp.transpose(params["w2"], (2, 3, 1, 0)).reshape(9, planes, planes)
          * s2[None, None, :]).astype(compute_dtype)

    if "ws" in params:
        # Projection shortcut (1x1 conv stride s + BN): fused as a second dot
        # inside the conv2 kernel; shifts combine additively.
        ss, bs = _fold_bn(*params["bn_s"])
        ws = (jnp.transpose(params["ws"], (2, 3, 1, 0)).reshape(Cin, planes)
              * ss[None, :]).astype(compute_dtype)
        xs = x[:, ::s, ::s, :][:, :Ho, :Wo, :]
        out = _fused_conv3x3(
            out1, w2, (b2 + bs).reshape(1, planes).astype(jnp.float32),
            stride=1, proj=(xs, ws), out_dtype=compute_dtype)
    else:
        if s != 1 or Cin != planes:
            raise ValueError(
                "Identity shortcut requires stride == 1 and in_planes == "
                f"planes; got stride={s}, in_planes={Cin}, planes={planes}.")
        out = _fused_conv3x3(
            out1, w2, b2.reshape(1, planes).astype(jnp.float32),
            stride=1, residual=x, out_dtype=compute_dtype)

    return jnp.transpose(out, (0, 3, 1, 2)).astype(jnp.float32)  # NCHW f32


# ---------------------------------------------------------------------------
# Pure-JAX reference (for correctness check)
# ---------------------------------------------------------------------------
def reference_forward(x, params, stride):
    def conv(xx, w, s, pad):
        return jax.lax.conv_general_dilated(
            xx, w, (s, s), [(pad, pad), (pad, pad)],
            dimension_numbers=("NCHW", "OIHW", "NCHW"))

    def bn(xx, gamma, beta, mean, var, eps=1e-5):
        g = gamma.reshape(1, -1, 1, 1)
        b = beta.reshape(1, -1, 1, 1)
        m = mean.reshape(1, -1, 1, 1)
        v = var.reshape(1, -1, 1, 1)
        return (xx - m) / jnp.sqrt(v + eps) * g + b

    out = jax.nn.relu(bn(conv(x, params["w1"], stride, 1), *params["bn1"]))
    out = bn(conv(out, params["w2"], 1, 1), *params["bn2"])
    if "ws" in params:
        sc = bn(conv(x, params["ws"], stride, 0), *params["bn_s"])
    else:
        sc = x
    return jax.nn.relu(out + sc)


# ---------------------------------------------------------------------------
if __name__ == "__main__":
    key = jax.random.PRNGKey(0)
    fwd = jax.jit(basic_block_forward, static_argnames=("stride",))

    def bn_params(ka, kb, kc, kd, c):
        gamma = 1.0 + 0.1 * jax.random.normal(ka, (c,), jnp.float32)
        beta = 0.1 * jax.random.normal(kb, (c,), jnp.float32)
        mean = 0.1 * jax.random.normal(kc, (c,), jnp.float32)
        var = 1.0 + 0.1 * jnp.abs(jax.random.normal(kd, (c,), jnp.float32))
        return (gamma, beta, mean, var)

    # --- case 1: projection shortcut (stride=2, 4 -> 8 channels) ---
    in_planes, planes, stride = 4, 8, 2
    N, H, W = 2, 16, 16
    k = jax.random.split(key, 17)
    x = jax.random.normal(k[0], (N, in_planes, H, W), jnp.float32)
    params = {
        "w1": 0.1 * jax.random.normal(k[1], (planes, in_planes, 3, 3), jnp.float32),
        "bn1": bn_params(k[2], k[3], k[4], k[5], planes),
        "w2": 0.1 * jax.random.normal(k[6], (planes, planes, 3, 3), jnp.float32),
        "bn2": bn_params(k[7], k[8], k[9], k[10], planes),
        "ws": 0.1 * jax.random.normal(k[11], (planes, in_planes, 1, 1), jnp.float32),
        "bn_s": bn_params(k[12], k[13], k[14], k[15], planes),
    }
    out = jax.block_until_ready(fwd(x, params, stride=stride))
    assert out.shape == (N, planes, H // stride, W // stride), out.shape
    ref = reference_forward(x, params, stride)
    np.testing.assert_allclose(np.asarray(out), np.asarray(ref),
                               rtol=3e-2, atol=3e-2)

    # --- case 2: identity shortcut (stride=1, 8 -> 8 channels) ---
    key2 = jax.random.PRNGKey(1)
    k2 = jax.random.split(key2, 12)
    in_planes2 = planes2 = 8
    x2 = jax.random.normal(k2[0], (N, in_planes2, H, W), jnp.float32)
    params2 = {
        "w1": 0.1 * jax.random.normal(k2[1], (planes2, in_planes2, 3, 3), jnp.float32),
        "bn1": bn_params(k2[2], k2[3], k2[4], k2[5], planes2),
        "w2": 0.1 * jax.random.normal(k2[6], (planes2, planes2, 3, 3), jnp.float32),
        "bn2": bn_params(k2[7], k2[8], k2[9], k2[10], planes2),
    }
    out2 = jax.block_until_ready(fwd(x2, params2, stride=1))
    assert out2.shape == (N, planes2, H, W), out2.shape
    ref2 = reference_forward(x2, params2, 1)
    np.testing.assert_allclose(np.asarray(out2), np.asarray(ref2),
                               rtol=3e-2, atol=3e-2)

    print("KERNEL_OK")
</pallas_src>

<mosaic_0001>
module attributes {stable_mosaic.version = 11 : i64} {
  func.func @kernel(%arg0: i32, %arg1: i32, %arg2: memref<1x2x9x2x9x4xbf16, #tpu.memory_space<vmem>>, %arg3: memref<9x4x8xbf16, #tpu.memory_space<vmem>>, %arg4: memref<1x8xf32, #tpu.memory_space<vmem>>, %arg5: memref<1x8x8x8xbf16, #tpu.memory_space<vmem>>) attributes {dimension_semantics = [#tpu.dimension_semantics<parallel>, #tpu.dimension_semantics<parallel>], iteration_bounds = array<i64: 2, 1>, scalar_prefetch = 0 : i64, scratch_operands = 0 : i64, tpu.core_type = #tpu.core_type<tc>, window_params = [{transform_indices = @transform_0, window_bounds = array<i64: 1, 2, 9, 2, 9, 4>}, {pipeline_mode = #tpu.pipeline_mode<synchronous>, transform_indices = @transform_1, window_bounds = array<i64: 9, 4, 8>}, {pipeline_mode = #tpu.pipeline_mode<synchronous>, transform_indices = @transform_2, window_bounds = array<i64: 1, 8>}, {transform_indices = @transform_3, window_bounds = array<i64: 1, 8, 8, 8>}]} {
    %c8_i32 = arith.constant 8 : i32
    %0 = arith.muli %arg1, %c8_i32 : i32
    %cst = arith.constant 0.000000e+00 : f32
    %1 = vector.broadcast %cst : f32 to vector<64x8xf32>
    %c0_i32 = arith.constant 0 : i32
    %2 = arith.addi %0, %c0_i32 : i32
    %c0 = arith.constant 0 : index
    %c0_0 = arith.constant 0 : index
    %3 = arith.index_cast %2 : i32 to index
    %c0_1 = arith.constant 0 : index
    %c0_2 = arith.constant 0 : index
    %c0_3 = arith.constant 0 : index
    %4 = vector.load %arg2[%c0, %c0_0, %3, %c0_1, %c0_2, %c0_3] : memref<1x2x9x2x9x4xbf16, #tpu.memory_space<vmem>>, vector<1x1x8x2x9x4xbf16>
    %5 = vector.shape_cast %4 : vector<1x1x8x2x9x4xbf16> to vector<8x2x9x4xbf16>
    %6 = vector.extract_strided_slice %5 {offsets = [0, 0, 0, 0], sizes = [8, 1, 8, 4], strides = [1, 1, 1, 1]} : vector<8x2x9x4xbf16> to vector<8x1x8x4xbf16>
    %7 = vector.shape_cast %6 : vector<8x1x8x4xbf16> to vector<8x8x4xbf16>
    %8 = vector.shape_cast %7 : vector<8x8x4xbf16> to vector<64x4xbf16>
    %c0_4 = arith.constant 0 : index
    %c0_5 = arith.constant 0 : index
    %c0_6 = arith.constant 0 : index
    %9 = vector.load %arg3[%c0_4, %c0_5, %c0_6] : memref<9x4x8xbf16, #tpu.memory_space<vmem>>, vector<1x4x8xbf16>
    %10 = vector.shape_cast %9 : vector<1x4x8xbf16> to vector<4x8xbf16>
    %cst_7 = arith.constant dense<0.000000e+00> : vector<64x8xf32>
    %11 = tpu.matmul %8, %10, %cst_7 {dimension_numbers = #tpu.dot_dimension_numbers<[1], [0], [0], [1], [0, 0, 1, 1], [], []>} : vector<64x4xbf16>, vector<4x8xbf16>, vector<64x8xf32> -> vector<64x8xf32>
    %12 = arith.addf %1, %11 : vector<64x8xf32>
    %13 = vector.extract_strided_slice %5 {offsets = [0, 1, 0, 0], sizes = [8, 1, 8, 4], strides = [1, 1, 1, 1]} : vector<8x2x9x4xbf16> to vector<8x1x8x4xbf16>
    %14 = vector.shape_cast %13 : vector<8x1x8x4xbf16> to vector<8x8x4xbf16>
    %15 = vector.shape_cast %14 : vector<8x8x4xbf16> to vector<64x4xbf16>
    %c1 = arith.constant 1 : index
    %c0_8 = arith.constant 0 : index
    %c0_9 = arith.constant 0 : index
    %16 = vector.load %arg3[%c1, %c0_8, %c0_9] : memref<9x4x8xbf16, #tpu.memory_space<vmem>>, vector<1x4x8xbf16>
    %17 = vector.shape_cast %16 : vector<1x4x8xbf16> to vector<4x8xbf16>
    %cst_10 = arith.constant dense<0.000000e+00> : vector<64x8xf32>
    %18 = tpu.matmul %15, %17, %cst_10 {dimension_numbers = #tpu.dot_dimension_numbers<[1], [0], [0], [1], [0, 0, 1, 1], [], []>} : vector<64x4xbf16>, vector<4x8xbf16>, vector<64x8xf32> -> vector<64x8xf32>
    %19 = arith.addf %12, %18 : vector<64x8xf32>
    %20 = vector.extract_strided_slice %5 {offsets = [0, 0, 1, 0], sizes = [8, 1, 8, 4], strides = [1, 1, 1, 1]} : vector<8x2x9x4xbf16> to vector<8x1x8x4xbf16>
    %21 = vector.shape_cast %20 : vector<8x1x8x4xbf16> to vector<8x8x4xbf16>
    %22 = vector.shape_cast %21 : vector<8x8x4xbf16> to vector<64x4xbf16>
    %c2 = arith.constant 2 : index
    %c0_11 = arith.constant 0 : index
    %c0_12 = arith.constant 0 : index
    %23 = vector.load %arg3[%c2, %c0_11, %c0_12] : memref<9x4x8xbf16, #tpu.memory_space<vmem>>, vector<1x4x8xbf16>
    %24 = vector.shape_cast %23 : vector<1x4x8xbf16> to vector<4x8xbf16>
    %cst_13 = arith.constant dense<0.000000e+00> : vector<64x8xf32>
    %25 = tpu.matmul %22, %24, %cst_13 {dimension_numbers = #tpu.dot_dimension_numbers<[1], [0], [0], [1], [0, 0, 1, 1], [], []>} : vector<64x4xbf16>, vector<4x8xbf16>, vector<64x8xf32> -> vector<64x8xf32>
    %26 = arith.addf %19, %25 : vector<64x8xf32>
    %c0_i32_14 = arith.constant 0 : i32
    %27 = arith.addi %0, %c0_i32_14 : i32
    %c0_15 = arith.constant 0 : index
    %c1_16 = arith.constant 1 : index
    %28 = arith.index_cast %27 : i32 to index
    %c0_17 = arith.constant 0 : index
    %c0_18 = arith.constant 0 : index
    %c0_19 = arith.constant 0 : index
    %29 = vector.load %arg2[%c0_15, %c1_16, %28, %c0_17, %c0_18, %c0_19] : memref<1x2x9x2x9x4xbf16, #tpu.memory_space<vmem>>, vector<1x1x8x2x9x4xbf16>
    %30 = vector.shape_cast %29 : vector<1x1x8x2x9x4xbf16> to vector<8x2x9x4xbf16>
    %31 = vector.extract_strided_slice %30 {offsets = [0, 0, 0, 0], sizes = [8, 1, 8, 4], strides = [1, 1, 1, 1]} : vector<8x2x9x4xbf16> to vector<8x1x8x4xbf16>
    %32 = vector.shape_cast %31 : vector<8x1x8x4xbf16> to vector<8x8x4xbf16>
    %33 = vector.shape_cast %32 : vector<8x8x4xbf16> to vector<64x4xbf16>
    %c3 = arith.constant 3 : index
    %c0_20 = arith.constant 0 : index
    %c0_21 = arith.constant 0 : index
    %34 = vector.load %arg3[%c3, %c0_20, %c0_21] : memref<9x4x8xbf16, #tpu.memory_space<vmem>>, vector<1x4x8xbf16>
    %35 = vector.shape_cast %34 : vector<1x4x8xbf16> to vector<4x8xbf16>
    %cst_22 = arith.constant dense<0.000000e+00> : vector<64x8xf32>
    %36 = tpu.matmul %33, %35, %cst_22 {dimension_numbers = #tpu.dot_dimension_numbers<[1], [0], [0], [1], [0, 0, 1, 1], [], []>} : vector<64x4xbf16>, vector<4x8xbf16>, vector<64x8xf32> -> vector<64x8xf32>
    %37 = arith.addf %26, %36 : vector<64x8xf32>
    %38 = vector.extract_strided_slice %30 {offsets = [0, 1, 0, 0], sizes = [8, 1, 8, 4], strides = [1, 1, 1, 1]} : vector<8x2x9x4xbf16> to vector<8x1x8x4xbf16>
    %39 = vector.shape_cast %38 : vector<8x1x8x4xbf16> to vector<8x8x4xbf16>
    %40 = vector.shape_cast %39 : vector<8x8x4xbf16> to vector<64x4xbf16>
    %c4 = arith.constant 4 : index
    %c0_23 = arith.constant 0 : index
    %c0_24 = arith.constant 0 : index
    %41 = vector.load %arg3[%c4, %c0_23, %c0_24] : memref<9x4x8xbf16, #tpu.memory_space<vmem>>, vector<1x4x8xbf16>
    %42 = vector.shape_cast %41 : vector<1x4x8xbf16> to vector<4x8xbf16>
    %cst_25 = arith.constant dense<0.000000e+00> : vector<64x8xf32>
    %43 = tpu.matmul %40, %42, %cst_25 {dimension_numbers = #tpu.dot_dimension_numbers<[1], [0], [0], [1], [0, 0, 1, 1], [], []>} : vector<64x4xbf16>, vector<4x8xbf16>, vector<64x8xf32> -> vector<64x8xf32>
    %44 = arith.addf %37, %43 : vector<64x8xf32>
    %45 = vector.extract_strided_slice %30 {offsets = [0, 0, 1, 0], sizes = [8, 1, 8, 4], strides = [1, 1, 1, 1]} : vector<8x2x9x4xbf16> to vector<8x1x8x4xbf16>
    %46 = vector.shape_cast %45 : vector<8x1x8x4xbf16> to vector<8x8x4xbf16>
    %47 = vector.shape_cast %46 : vector<8x8x4xbf16> to vector<64x4xbf16>
    %c5 = arith.constant 5 : index
    %c0_26 = arith.constant 0 : index
    %c0_27 = arith.constant 0 : index
    %48 = vector.load %arg3[%c5, %c0_26, %c0_27] : memref<9x4x8xbf16, #tpu.memory_space<vmem>>, vector<1x4x8xbf16>
    %49 = vector.shape_cast %48 : vector<1x4x8xbf16> to vector<4x8xbf16>
    %cst_28 = arith.constant dense<0.000000e+00> : vector<64x8xf32>
    %50 = tpu.matmul %47, %49, %cst_28 {dimension_numbers = #tpu.dot_dimension_numbers<[1], [0], [0], [1], [0, 0, 1, 1], [], []>} : vector<64x4xbf16>, vector<4x8xbf16>, vector<64x8xf32> -> vector<64x8xf32>
    %51 = arith.addf %44, %50 : vector<64x8xf32>
    %c1_i32 = arith.constant 1 : i32
    %52 = arith.addi %0, %c1_i32 : i32
    %c0_29 = arith.constant 0 : index
    %c0_30 = arith.constant 0 : index
    %53 = arith.index_cast %52 : i32 to index
    %c0_31 = arith.constant 0 : index
    %c0_32 = arith.constant 0 : index
    %c0_33 = arith.constant 0 : index
    %54 = vector.load %arg2[%c0_29, %c0_30, %53, %c0_31, %c0_32, %c0_33] : memref<1x2x9x2x9x4xbf16, #tpu.memory_space<vmem>>, vector<1x1x8x2x9x4xbf16>
    %55 = vector.shape_cast %54 : vector<1x1x8x2x9x4xbf16> to vector<8x2x9x4xbf16>
    %56 = vector.extract_strided_slice %55 {offsets = [0, 0, 0, 0], sizes = [8, 1, 8, 4], strides = [1, 1, 1, 1]} : vector<8x2x9x4xbf16> to vector<8x1x8x4xbf16>
    %57 = vector.shape_cast %56 : vector<8x1x8x4xbf16> to vector<8x8x4xbf16>
    %58 = vector.shape_cast %57 : vector<8x8x4xbf16> to vector<64x4xbf16>
    %c6 = arith.constant 6 : index
    %c0_34 = arith.constant 0 : index
    %c0_35 = arith.constant 0 : index
    %59 = vector.load %arg3[%c6, %c0_34, %c0_35] : memref<9x4x8xbf16, #tpu.memory_space<vmem>>, vector<1x4x8xbf16>
    %60 = vector.shape_cast %59 : vector<1x4x8xbf16> to vector<4x8xbf16>
    %cst_36 = arith.constant dense<0.000000e+00> : vector<64x8xf32>
    %61 = tpu.matmul %58, %60, %cst_36 {dimension_numbers = #tpu.dot_dimension_numbers<[1], [0], [0], [1], [0, 0, 1, 1], [], []>} : vector<64x4xbf16>, vector<4x8xbf16>, vector<64x8xf32> -> vector<64x8xf32>
    %62 = arith.addf %51, %61 : vector<64x8xf32>
    %63 = vector.extract_strided_slice %55 {offsets = [0, 1, 0, 0], sizes = [8, 1, 8, 4], strides = [1, 1, 1, 1]} : vector<8x2x9x4xbf16> to vector<8x1x8x4xbf16>
    %64 = vector.shape_cast %63 : vector<8x1x8x4xbf16> to vector<8x8x4xbf16>
    %65 = vector.shape_cast %64 : vector<8x8x4xbf16> to vector<64x4xbf16>
    %c7 = arith.constant 7 : index
    %c0_37 = arith.constant 0 : index
    %c0_38 = arith.constant 0 : index
    %66 = vector.load %arg3[%c7, %c0_37, %c0_38] : memref<9x4x8xbf16, #tpu.memory_space<vmem>>, vector<1x4x8xbf16>
    %67 = vector.shape_cast %66 : vector<1x4x8xbf16> to vector<4x8xbf16>
    %cst_39 = arith.constant dense<0.000000e+00> : vector<64x8xf32>
    %68 = tpu.matmul %65, %67, %cst_39 {dimension_numbers = #tpu.dot_dimension_numbers<[1], [0], [0], [1], [0, 0, 1, 1], [], []>} : vector<64x4xbf16>, vector<4x8xbf16>, vector<64x8xf32> -> vector<64x8xf32>
    %69 = arith.addf %62, %68 : vector<64x8xf32>
    %70 = vector.extract_strided_slice %55 {offsets = [0, 0, 1, 0], sizes = [8, 1, 8, 4], strides = [1, 1, 1, 1]} : vector<8x2x9x4xbf16> to vector<8x1x8x4xbf16>
    %71 = vector.shape_cast %70 : vector<8x1x8x4xbf16> to vector<8x8x4xbf16>
    %72 = vector.shape_cast %71 : vector<8x8x4xbf16> to vector<64x4xbf16>
    %c8 = arith.constant 8 : index
    %c0_40 = arith.constant 0 : index
    %c0_41 = arith.constant 0 : index
    %73 = vector.load %arg3[%c8, %c0_40, %c0_41] : memref<9x4x8xbf16, #tpu.memory_space<vmem>>, vector<1x4x8xbf16>
    %74 = vector.shape_cast %73 : vector<1x4x8xbf16> to vector<4x8xbf16>
    %cst_42 = arith.constant dense<0.000000e+00> : vector<64x8xf32>
    %75 = tpu.matmul %72, %74, %cst_42 {dimension_numbers = #tpu.dot_dimension_numbers<[1], [0], [0], [1], [0, 0, 1, 1], [], []>} : vector<64x4xbf16>, vector<4x8xbf16>, vector<64x8xf32> -> vector<64x8xf32>
    %76 = arith.addf %69, %75 : vector<64x8xf32>
    %c0_43 = arith.constant 0 : index
    %c0_44 = arith.constant 0 : index
    %77 = vector.load %arg4[%c0_43, %c0_44] : memref<1x8xf32, #tpu.memory_space<vmem>>, vector<1x8xf32>
    %78 = vector.broadcast %77 : vector<1x8xf32> to vector<64x8xf32>
    %79 = arith.addf %76, %78 : vector<64x8xf32>
    %cst_45 = arith.constant 0.000000e+00 : f32
    %80 = vector.broadcast %cst_45 : f32 to vector<64x8xf32>
    %81 = arith.maximumf %79, %80 : vector<64x8xf32>
    %82 = vector.shape_cast %81 : vector<64x8xf32> to vector<8x8x8xf32>
    %83 = arith.truncf %82 : vector<8x8x8xf32> to vector<8x8x8xbf16>
    %c0_46 = arith.constant 0 : index
    %c0_47 = arith.constant 0 : index
    %c0_48 = arith.constant 0 : index
    %c0_49 = arith.constant 0 : index
    %84 = vector.load %arg5[%c0_46, %c0_47, %c0_48, %c0_49] : memref<1x8x8x8xbf16, #tpu.memory_space<vmem>>, vector<1x8x8x8xbf16>
    %85 = vector.shape_cast %84 : vector<1x8x8x8xbf16> to vector<8x8x8xbf16>
    %86 = vector.shape_cast %83 : vector<8x8x8xbf16> to vector<1x8x8x8xbf16>
    tpu.vector_store %arg5[%c0_46, %c0_47, %c0_48, %c0_49], %86 {strides = array<i32>} : memref<1x8x8x8xbf16, #tpu.memory_space<vmem>>, vector<1x8x8x8xbf16>,
    return
  }
  func.func @transform_0(%arg0: i32, %arg1: i32) -> (i32, i32, i32, i32, i32, i32) {
    %c0_i32 = arith.constant 0 : i32
    %c0_i32_0 = arith.constant 0 : i32
    %c0_i32_1 = arith.constant 0 : i32
    %c0_i32_2 = arith.constant 0 : i32
    %c0_i32_3 = arith.constant 0 : i32
    %c0_i32_4 = arith.constant 0 : i32
    return %arg0, %c0_i32, %c0_i32_0, %c0_i32_1, %c0_i32_2, %c0_i32_3 : i32, i32, i32, i32, i32, i32
  }
  func.func @transform_1(%arg0: i32, %arg1: i32) -> (i32, i32, i32) {
    %c0_i32 = arith.constant 0 : i32
    %c0_i32_0 = arith.constant 0 : i32
    %c0_i32_1 = arith.constant 0 : i32
    %c0_i32_2 = arith.constant 0 : i32
    return %c0_i32, %c0_i32_0, %c0_i32_1 : i32, i32, i32
  }
  func.func @transform_2(%arg0: i32, %arg1: i32) -> (i32, i32) {
    %c0_i32 = arith.constant 0 : i32
    %c0_i32_0 = arith.constant 0 : i32
    %c0_i32_1 = arith.constant 0 : i32
    return %c0_i32, %c0_i32_0 : i32, i32
  }
  func.func @transform_3(%arg0: i32, %arg1: i32) -> (i32, i32, i32, i32) {
    %c0_i32 = arith.constant 0 : i32
    %c0_i32_0 = arith.constant 0 : i32
    %c0_i32_1 = arith.constant 0 : i32
    return %arg0, %arg1, %c0_i32, %c0_i32_0 : i32, i32, i32, i32
  }
}

module attributes {stable_mosaic.version = 11 : i64} {
  func.func @kernel(%arg0: i32, %arg1: i32, %arg2: memref<1x1x10x1x10x8xbf16, #tpu.memory_space<vmem>>, %arg3: memref<9x8x8xbf16, #tpu.memory_space<vmem>>, %arg4: memref<1x8xf32, #tpu.memory_space<vmem>>, %arg5: memref<1x8x8x4xbf16, #tpu.memory_space<vmem>>, %arg6: memref<4x8xbf16, #tpu.memory_space<vmem>>, %arg7: memref<1x8x8x8xbf16, #tpu.memory_space<vmem>>) attributes {dimension_semantics = [#tpu.dimension_semantics<parallel>, #tpu.dimension_semantics<parallel>], iteration_bounds = array<i64: 2, 1>, scalar_prefetch = 0 : i64, scratch_operands = 0 : i64, tpu.core_type = #tpu.core_type<tc>, window_params = [{transform_indices = @transform_0, window_bounds = array<i64: 1, 1, 10, 1, 10, 8>}, {pipeline_mode = #tpu.pipeline_mode<synchronous>, transform_indices = @transform_1, window_bounds = array<i64: 9, 8, 8>}, {pipeline_mode = #tpu.pipeline_mode<synchronous>, transform_indices = @transform_2, window_bounds = array<i64: 1, 8>}, {transform_indices = @transform_3, window_bounds = array<i64: 1, 8, 8, 4>}, {pipeline_mode = #tpu.pipeline_mode<synchronous>, transform_indices = @transform_4, window_bounds = array<i64: 4, 8>}, {transform_indices = @transform_5, window_bounds = array<i64: 1, 8, 8, 8>}]} {
    %c8_i32 = arith.constant 8 : i32
    %0 = arith.muli %arg1, %c8_i32 : i32
    %cst = arith.constant 0.000000e+00 : f32
    %1 = vector.broadcast %cst : f32 to vector<64x8xf32>
    %c0_i32 = arith.constant 0 : i32
    %2 = arith.addi %0, %c0_i32 : i32
    %c0 = arith.constant 0 : index
    %c0_0 = arith.constant 0 : index
    %3 = arith.index_cast %2 : i32 to index
    %c0_1 = arith.constant 0 : index
    %c0_2 = arith.constant 0 : index
    %c0_3 = arith.constant 0 : index
    %4 = vector.load %arg2[%c0, %c0_0, %3, %c0_1, %c0_2, %c0_3] : memref<1x1x10x1x10x8xbf16, #tpu.memory_space<vmem>>, vector<1x1x8x1x10x8xbf16>
    %5 = vector.shape_cast %4 : vector<1x1x8x1x10x8xbf16> to vector<8x1x10x8xbf16>
    %6 = vector.extract_strided_slice %5 {offsets = [0, 0, 0, 0], sizes = [8, 1, 8, 8], strides = [1, 1, 1, 1]} : vector<8x1x10x8xbf16> to vector<8x1x8x8xbf16>
    %7 = vector.shape_cast %6 : vector<8x1x8x8xbf16> to vector<8x8x8xbf16>
    %8 = vector.shape_cast %7 : vector<8x8x8xbf16> to vector<64x8xbf16>
    %c0_4 = arith.constant 0 : index
    %c0_5 = arith.constant 0 : index
    %c0_6 = arith.constant 0 : index
    %9 = vector.load %arg3[%c0_4, %c0_5, %c0_6] : memref<9x8x8xbf16, #tpu.memory_space<vmem>>, vector<1x8x8xbf16>
    %10 = vector.shape_cast %9 : vector<1x8x8xbf16> to vector<8x8xbf16>
    %cst_7 = arith.constant dense<0.000000e+00> : vector<64x8xf32>
    %11 = tpu.matmul %8, %10, %cst_7 {dimension_numbers = #tpu.dot_dimension_numbers<[1], [0], [0], [1], [0, 0, 1, 1], [], []>} : vector<64x8xbf16>, vector<8x8xbf16>, vector<64x8xf32> -> vector<64x8xf32>
    %12 = arith.addf %1, %11 : vector<64x8xf32>
    %13 = vector.extract_strided_slice %5 {offsets = [0, 0, 1, 0], sizes = [8, 1, 8, 8], strides = [1, 1, 1, 1]} : vector<8x1x10x8xbf16> to vector<8x1x8x8xbf16>
    %14 = vector.shape_cast %13 : vector<8x1x8x8xbf16> to vector<8x8x8xbf16>
    %15 = vector.shape_cast %14 : vector<8x8x8xbf16> to vector<64x8xbf16>
    %c1 = arith.constant 1 : index
    %c0_8 = arith.constant 0 : index
    %c0_9 = arith.constant 0 : index
    %16 = vector.load %arg3[%c1, %c0_8, %c0_9] : memref<9x8x8xbf16, #tpu.memory_space<vmem>>, vector<1x8x8xbf16>
    %17 = vector.shape_cast %16 : vector<1x8x8xbf16> to vector<8x8xbf16>
    %cst_10 = arith.constant dense<0.000000e+00> : vector<64x8xf32>
    %18 = tpu.matmul %15, %17, %cst_10 {dimension_numbers = #tpu.dot_dimension_numbers<[1], [0], [0], [1], [0, 0, 1, 1], [], []>} : vector<64x8xbf16>, vector<8x8xbf16>, vector<64x8xf32> -> vector<64x8xf32>
    %19 = arith.addf %12, %18 : vector<64x8xf32>
    %20 = vector.extract_strided_slice %5 {offsets = [0, 0, 2, 0], sizes = [8, 1, 8, 8], strides = [1, 1, 1, 1]} : vector<8x1x10x8xbf16> to vector<8x1x8x8xbf16>
    %21 = vector.shape_cast %20 : vector<8x1x8x8xbf16> to vector<8x8x8xbf16>
    %22 = vector.shape_cast %21 : vector<8x8x8xbf16> to vector<64x8xbf16>
    %c2 = arith.constant 2 : index
    %c0_11 = arith.constant 0 : index
    %c0_12 = arith.constant 0 : index
    %23 = vector.load %arg3[%c2, %c0_11, %c0_12] : memref<9x8x8xbf16, #tpu.memory_space<vmem>>, vector<1x8x8xbf16>
    %24 = vector.shape_cast %23 : vector<1x8x8xbf16> to vector<8x8xbf16>
    %cst_13 = arith.constant dense<0.000000e+00> : vector<64x8xf32>
    %25 = tpu.matmul %22, %24, %cst_13 {dimension_numbers = #tpu.dot_dimension_numbers<[1], [0], [0], [1], [0, 0, 1, 1], [], []>} : vector<64x8xbf16>, vector<8x8xbf16>, vector<64x8xf32> -> vector<64x8xf32>
    %26 = arith.addf %19, %25 : vector<64x8xf32>
    %c1_i32 = arith.constant 1 : i32
    %27 = arith.addi %0, %c1_i32 : i32
    %c0_14 = arith.constant 0 : index
    %c0_15 = arith.constant 0 : index
    %28 = arith.index_cast %27 : i32 to index
    %c0_16 = arith.constant 0 : index
    %c0_17 = arith.constant 0 : index
    %c0_18 = arith.constant 0 : index
    %29 = vector.load %arg2[%c0_14, %c0_15, %28, %c0_16, %c0_17, %c0_18] : memref<1x1x10x1x10x8xbf16, #tpu.memory_space<vmem>>, vector<1x1x8x1x10x8xbf16>
    %30 = vector.shape_cast %29 : vector<1x1x8x1x10x8xbf16> to vector<8x1x10x8xbf16>
    %31 = vector.extract_strided_slice %30 {offsets = [0, 0, 0, 0], sizes = [8, 1, 8, 8], strides = [1, 1, 1, 1]} : vector<8x1x10x8xbf16> to vector<8x1x8x8xbf16>
    %32 = vector.shape_cast %31 : vector<8x1x8x8xbf16> to vector<8x8x8xbf16>
    %33 = vector.shape_cast %32 : vector<8x8x8xbf16> to vector<64x8xbf16>
    %c3 = arith.constant 3 : index
    %c0_19 = arith.constant 0 : index
    %c0_20 = arith.constant 0 : index
    %34 = vector.load %arg3[%c3, %c0_19, %c0_20] : memref<9x8x8xbf16, #tpu.memory_space<vmem>>, vector<1x8x8xbf16>
    %35 = vector.shape_cast %34 : vector<1x8x8xbf16> to vector<8x8xbf16>
    %cst_21 = arith.constant dense<0.000000e+00> : vector<64x8xf32>
    %36 = tpu.matmul %33, %35, %cst_21 {dimension_numbers = #tpu.dot_dimension_numbers<[1], [0], [0], [1], [0, 0, 1, 1], [], []>} : vector<64x8xbf16>, vector<8x8xbf16>, vector<64x8xf32> -> vector<64x8xf32>
    %37 = arith.addf %26, %36 : vector<64x8xf32>
    %38 = vector.extract_strided_slice %30 {offsets = [0, 0, 1, 0], sizes = [8, 1, 8, 8], strides = [1, 1, 1, 1]} : vector<8x1x10x8xbf16> to vector<8x1x8x8xbf16>
    %39 = vector.shape_cast %38 : vector<8x1x8x8xbf16> to vector<8x8x8xbf16>
    %40 = vector.shape_cast %39 : vector<8x8x8xbf16> to vector<64x8xbf16>
    %c4 = arith.constant 4 : index
    %c0_22 = arith.constant 0 : index
    %c0_23 = arith.constant 0 : index
    %41 = vector.load %arg3[%c4, %c0_22, %c0_23] : memref<9x8x8xbf16, #tpu.memory_space<vmem>>, vector<1x8x8xbf16>
    %42 = vector.shape_cast %41 : vector<1x8x8xbf16> to vector<8x8xbf16>
    %cst_24 = arith.constant dense<0.000000e+00> : vector<64x8xf32>
    %43 = tpu.matmul %40, %42, %cst_24 {dimension_numbers = #tpu.dot_dimension_numbers<[1], [0], [0], [1], [0, 0, 1, 1], [], []>} : vector<64x8xbf16>, vector<8x8xbf16>, vector<64x8xf32> -> vector<64x8xf32>
    %44 = arith.addf %37, %43 : vector<64x8xf32>
    %45 = vector.extract_strided_slice %30 {offsets = [0, 0, 2, 0], sizes = [8, 1, 8, 8], strides = [1, 1, 1, 1]} : vector<8x1x10x8xbf16> to vector<8x1x8x8xbf16>
    %46 = vector.shape_cast %45 : vector<8x1x8x8xbf16> to vector<8x8x8xbf16>
    %47 = vector.shape_cast %46 : vector<8x8x8xbf16> to vector<64x8xbf16>
    %c5 = arith.constant 5 : index
    %c0_25 = arith.constant 0 : index
    %c0_26 = arith.constant 0 : index
    %48 = vector.load %arg3[%c5, %c0_25, %c0_26] : memref<9x8x8xbf16, #tpu.memory_space<vmem>>, vector<1x8x8xbf16>
    %49 = vector.shape_cast %48 : vector<1x8x8xbf16> to vector<8x8xbf16>
    %cst_27 = arith.constant dense<0.000000e+00> : vector<64x8xf32>
    %50 = tpu.matmul %47, %49, %cst_27 {dimension_numbers = #tpu.dot_dimension_numbers<[1], [0], [0], [1], [0, 0, 1, 1], [], []>} : vector<64x8xbf16>, vector<8x8xbf16>, vector<64x8xf32> -> vector<64x8xf32>
    %51 = arith.addf %44, %50 : vector<64x8xf32>
    %c2_i32 = arith.constant 2 : i32
    %52 = arith.addi %0, %c2_i32 : i32
    %c0_28 = arith.constant 0 : index
    %c0_29 = arith.constant 0 : index
    %53 = arith.index_cast %52 : i32 to index
    %c0_30 = arith.constant 0 : index
    %c0_31 = arith.constant 0 : index
    %c0_32 = arith.constant 0 : index
    %54 = vector.load %arg2[%c0_28, %c0_29, %53, %c0_30, %c0_31, %c0_32] : memref<1x1x10x1x10x8xbf16, #tpu.memory_space<vmem>>, vector<1x1x8x1x10x8xbf16>
    %55 = vector.shape_cast %54 : vector<1x1x8x1x10x8xbf16> to vector<8x1x10x8xbf16>
    %56 = vector.extract_strided_slice %55 {offsets = [0, 0, 0, 0], sizes = [8, 1, 8, 8], strides = [1, 1, 1, 1]} : vector<8x1x10x8xbf16> to vector<8x1x8x8xbf16>
    %57 = vector.shape_cast %56 : vector<8x1x8x8xbf16> to vector<8x8x8xbf16>
    %58 = vector.shape_cast %57 : vector<8x8x8xbf16> to vector<64x8xbf16>
    %c6 = arith.constant 6 : index
    %c0_33 = arith.constant 0 : index
    %c0_34 = arith.constant 0 : index
    %59 = vector.load %arg3[%c6, %c0_33, %c0_34] : memref<9x8x8xbf16, #tpu.memory_space<vmem>>, vector<1x8x8xbf16>
    %60 = vector.shape_cast %59 : vector<1x8x8xbf16> to vector<8x8xbf16>
    %cst_35 = arith.constant dense<0.000000e+00> : vector<64x8xf32>
    %61 = tpu.matmul %58, %60, %cst_35 {dimension_numbers = #tpu.dot_dimension_numbers<[1], [0], [0], [1], [0, 0, 1, 1], [], []>} : vector<64x8xbf16>, vector<8x8xbf16>, vector<64x8xf32> -> vector<64x8xf32>
    %62 = arith.addf %51, %61 : vector<64x8xf32>
    %63 = vector.extract_strided_slice %55 {offsets = [0, 0, 1, 0], sizes = [8, 1, 8, 8], strides = [1, 1, 1, 1]} : vector<8x1x10x8xbf16> to vector<8x1x8x8xbf16>
    %64 = vector.shape_cast %63 : vector<8x1x8x8xbf16> to vector<8x8x8xbf16>
    %65 = vector.shape_cast %64 : vector<8x8x8xbf16> to vector<64x8xbf16>
    %c7 = arith.constant 7 : index
    %c0_36 = arith.constant 0 : index
    %c0_37 = arith.constant 0 : index
    %66 = vector.load %arg3[%c7, %c0_36, %c0_37] : memref<9x8x8xbf16, #tpu.memory_space<vmem>>, vector<1x8x8xbf16>
    %67 = vector.shape_cast %66 : vector<1x8x8xbf16> to vector<8x8xbf16>
    %cst_38 = arith.constant dense<0.000000e+00> : vector<64x8xf32>
    %68 = tpu.matmul %65, %67, %cst_38 {dimension_numbers = #tpu.dot_dimension_numbers<[1], [0], [0], [1], [0, 0, 1, 1], [], []>} : vector<64x8xbf16>, vector<8x8xbf16>, vector<64x8xf32> -> vector<64x8xf32>
    %69 = arith.addf %62, %68 : vector<64x8xf32>
    %70 = vector.extract_strided_slice %55 {offsets = [0, 0, 2, 0], sizes = [8, 1, 8, 8], strides = [1, 1, 1, 1]} : vector<8x1x10x8xbf16> to vector<8x1x8x8xbf16>
    %71 = vector.shape_cast %70 : vector<8x1x8x8xbf16> to vector<8x8x8xbf16>
    %72 = vector.shape_cast %71 : vector<8x8x8xbf16> to vector<64x8xbf16>
    %c8 = arith.constant 8 : index
    %c0_39 = arith.constant 0 : index
    %c0_40 = arith.constant 0 : index
    %73 = vector.load %arg3[%c8, %c0_39, %c0_40] : memref<9x8x8xbf16, #tpu.memory_space<vmem>>, vector<1x8x8xbf16>
    %74 = vector.shape_cast %73 : vector<1x8x8xbf16> to vector<8x8xbf16>
    %cst_41 = arith.constant dense<0.000000e+00> : vector<64x8xf32>
    %75 = tpu.matmul %72, %74, %cst_41 {dimension_numbers = #tpu.dot_dimension_numbers<[1], [0], [0], [1], [0, 0, 1, 1], [], []>} : vector<64x8xbf16>, vector<8x8xbf16>, vector<64x8xf32> -> vector<64x8xf32>
    %76 = arith.addf %69, %75 : vector<64x8xf32>
    %c0_42 = arith.constant 0 : index
    %c0_43 = arith.constant 0 : index
    %77 = vector.load %arg4[%c0_42, %c0_43] : memref<1x8xf32, #tpu.memory_space<vmem>>, vector<1x8xf32>
    %78 = vector.broadcast %77 : vector<1x8xf32> to vector<64x8xf32>
    %79 = arith.addf %76, %78 : vector<64x8xf32>
    %c0_44 = arith.constant 0 : index
    %c0_45 = arith.constant 0 : index
    %c0_46 = arith.constant 0 : index
    %c0_47 = arith.constant 0 : index
    %80 = vector.load %arg5[%c0_44, %c0_45, %c0_46, %c0_47] : memref<1x8x8x4xbf16, #tpu.memory_space<vmem>>, vector<1x8x8x4xbf16>
    %81 = vector.shape_cast %80 : vector<1x8x8x4xbf16> to vector<8x8x4xbf16>
    %82 = vector.shape_cast %81 : vector<8x8x4xbf16> to vector<64x4xbf16>
    %c0_48 = arith.constant 0 : index
    %c0_49 = arith.constant 0 : index
    %83 = vector.load %arg6[%c0_48, %c0_49] : memref<4x8xbf16, #tpu.memory_space<vmem>>, vector<4x8xbf16>
    %cst_50 = arith.constant dense<0.000000e+00> : vector<64x8xf32>
    %84 = tpu.matmul %82, %83, %cst_50 {dimension_numbers = #tpu.dot_dimension_numbers<[1], [0], [0], [1], [0, 0, 1, 1], [], []>} : vector<64x4xbf16>, vector<4x8xbf16>, vector<64x8xf32> -> vector<64x8xf32>
    %85 = arith.addf %79, %84 : vector<64x8xf32>
    %cst_51 = arith.constant 0.000000e+00 : f32
    %86 = vector.broadcast %cst_51 : f32 to vector<64x8xf32>
    %87 = arith.maximumf %85, %86 : vector<64x8xf32>
    %88 = vector.shape_cast %87 : vector<64x8xf32> to vector<8x8x8xf32>
    %89 = arith.truncf %88 : vector<8x8x8xf32> to vector<8x8x8xbf16>
    %c0_52 = arith.constant 0 : index
    %c0_53 = arith.constant 0 : index
    %c0_54 = arith.constant 0 : index
    %c0_55 = arith.constant 0 : index
    %90 = vector.load %arg7[%c0_52, %c0_53, %c0_54, %c0_55] : memref<1x8x8x8xbf16, #tpu.memory_space<vmem>>, vector<1x8x8x8xbf16>
    %91 = vector.shape_cast %90 : vector<1x8x8x8xbf16> to vector<8x8x8xbf16>
    %92 = vector.shape_cast %89 : vector<8x8x8xbf16> to vector<1x8x8x8xbf16>
    tpu.vector_store %arg7[%c0_52, %c0_53, %c0_54, %c0_55], %92 {strides = array<i32>} : memref<1x8x8x8xbf16, #tpu.memory_space<vmem>>, vector<1x8x8x8xbf16>,
    return
  }
  func.func @transform_0(%arg0: i32, %arg1: i32) -> (i32, i32, i32, i32, i32, i32) {
    %c0_i32 = arith.constant 0 : i32
    %c0_i32_0 = arith.constant 0 : i32
    %c0_i32_1 = arith.constant 0 : i32
    %c0_i32_2 = arith.constant 0 : i32
    %c0_i32_3 = arith.constant 0 : i32
    %c0_i32_4 = arith.constant 0 : i32
    return %arg0, %c0_i32, %c0_i32_0, %c0_i32_1, %c0_i32_2, %c0_i32_3 : i32, i32, i32, i32, i32, i32
  }
  func.func @transform_1(%arg0: i32, %arg1: i32) -> (i32, i32, i32) {
    %c0_i32 = arith.constant 0 : i32
    %c0_i32_0 = arith.constant 0 : i32
    %c0_i32_1 = arith.constant 0 : i32
    %c0_i32_2 = arith.constant 0 : i32
    return %c0_i32, %c0_i32_0, %c0_i32_1 : i32, i32, i32
  }
  func.func @transform_2(%arg0: i32, %arg1: i32) -> (i32, i32) {
    %c0_i32 = arith.constant 0 : i32
    %c0_i32_0 = arith.constant 0 : i32
    %c0_i32_1 = arith.constant 0 : i32
    return %c0_i32, %c0_i32_0 : i32, i32
  }
  func.func @transform_3(%arg0: i32, %arg1: i32) -> (i32, i32, i32, i32) {
    %c0_i32 = arith.constant 0 : i32
    %c0_i32_0 = arith.constant 0 : i32
    %c0_i32_1 = arith.constant 0 : i32
    return %arg0, %arg1, %c0_i32, %c0_i32_0 : i32, i32, i32, i32
  }
  func.func @transform_4(%arg0: i32, %arg1: i32) -> (i32, i32) {
    %c0_i32 = arith.constant 0 : i32
    %c0_i32_0 = arith.constant 0 : i32
    %c0_i32_1 = arith.constant 0 : i32
    return %c0_i32, %c0_i32_0 : i32, i32
  }
  func.func @transform_5(%arg0: i32, %arg1: i32) -> (i32, i32, i32, i32) {
    %c0_i32 = arith.constant 0 : i32
    %c0_i32_0 = arith.constant 0 : i32
    %c0_i32_1 = arith.constant 0 : i32
    return %arg0, %arg1, %c0_i32, %c0_i32_0 : i32, i32, i32, i32
  }
}

</mosaic_0001>

<bundles_post_ra>
// kernel: basic_block_forward.3
= control target key start
LH: loop header
LB: loop body
LE: loop exit
PB: predicated region body
PF: predicated region fallthrough
CT: control target
= control target key end

     0   :  { %s2496_s18 = smov 0   ;;  %s2498_s19 = smov 0   ;;  %s3157_s0 = inlined_call_operand.vmem [shape: bf16[2,1,10,1,10,8], index: 0, kind: input, shape index: {}]   ;;  %s3158_s1 = inlined_call_operand.vmem [shape: bf16[9,8,8], index: 1, kind: input, shape index: {}]   ;;  %s3159_s2 = inlined_call_operand.vmem [shape: f32[1,8], index: 2, kind: input, shape index: {}]   ;;  %s3160_s3 = inlined_call_operand.vmem [shape: bf16[2,8,8,4], index: 3, kind: input, shape index: {}]   ;;  %s3161_s4 = inlined_call_operand.vmem [shape: bf16[4,8], index: 4, kind: input, shape index: {}]   ;;  %s3162_s5 = inlined_call_operand.vmem [shape: bf16[2,8,8,8], index: 5, kind: output, shape index: {}]  }
   0x1   :  { %s2500_s20 = smov 0  }
   0x2 LB: > { %s27_s21 = sadd.s32 1, %s2460_s19  ;;  %p2006_p0 = scmp.ge.s32.totalorder %s2464_s20, 1  ;;  %s2464_s20 = sphi %s2500_s20, %s15_s20   ;;  %s2460_s19 = sphi %s2498_s19, %s3241_s19   ;;  %s2456_s18 = sphi %s2496_s18, %s3240_s18  }
   0x3   : > { %p29_p1 = scmp.ge.s32.totalorder %s27_s21, 2  ;;  %p218_p2 = scmp.lt.s32.totalorder %s2464_s20, 3 }
   0x5   : > { %s3243_s21 = smov (%p29_p1, %s27_s21), 0  ;;  %p219_p3 = pnand %p2006_p0, %p218_p2 }
   0x7   : > { %222 = sbr.rel (%p219_p3) target bundleno = 350 (0x15e), region = 40 }
   0xe   : > { %vm448_vm0 = vcmask 1043456   ;;  %v2088_v0 = vld [vmem:[%s3158_s1 + $0x14] sm:$0xf]  ;;  %p259_p4 = scmp.lt.s32.totalorder %s2456_s18, 1  ;;  %v2012_v2 = vld [vmem:[%s3158_s1 + $0x4] sm:$0xf] }
   0xf   : > { %2396 = vmatprep.subr.msk.bf16.mxu0 %vm448_vm0, %v2088_v0  ;;  %v1173_v1 = vsel %vm448_vm0, %v2088_v0, 0  ;;  %2391 = vmatprep.subr.msk.bf16.mxu1 %vm448_vm0, %v2012_v2  ;;  %v450_v3 = vsel %vm448_vm0, %v2012_v2, 0  ;;  %v305_v4 = vld [vmem:[%s3158_s1] sm:$0xf]  ;;  %v2113_v5 = vld [vmem:[%s3158_s1 + $0x18] sm:$0xf] }
  0x10   : > { %2262 = vmatpush3.bf16.msra.mxu0 %v1173_v1  ;;  %s3245_s18 = smov (!%p259_p4, %s2456_s18), 1  ;;  %2212 = vmatpush3.bf16.msra.mxu1 %v450_v3  ;;  %v2535_v6 = vld [vmem:[%s3158_s1 + $0x8] sm:$0xf]  ;;  %vm435_vm1 = vcmask 64512   ;;  %vm625_vm2 = vcmask 1042432   ;;  %vm626_vm3 = vcmask 1046532  }
  0x11   : > { %s2401_s7 = smul.u32 80, %s3245_s18  ;;  %2392 = vmatprep.subr.msk.bf16.mxu1 %vm448_vm0, %v305_v4  ;;  %2397 = vmatprep.subr.msk.bf16.mxu0 %vm448_vm0, %v2113_v5  ;;  %v2543_v7 = vld [vmem:[%s3158_s1 + $0x1c] sm:$0xf]  ;;  %v2546_v8 = vsel %vm448_vm0, %v305_v4, 0  ;;  %v2549_v9 = vsel %vm448_vm0, %v2113_v5, 0  ;;  %v2568_v12 = vsel %vm448_vm0, %v2535_v6, 0  ;;  %vm2591_vm4 = vmor %vm625_vm2, %vm626_vm3 }
  0x12   : > { %v2554_v10 = vld [vmem:[%s3158_s1 + $0xc] sm:$0xf]  ;;  %v2559_v11 = vld [vmem:[%s3158_s1 + $0x20] sm:$0xf]  ;;  %v2572_v13 = vsel %vm448_vm0, %v2543_v7, 0  ;;  %s2159_s17 = sshll.u32 %s3245_s18, 5 }
  0x13   : > { %s2564_s16 = scalar_lea.vmem %s3157_s0, %s2401_s7  ;;  %v2576_v14 = vsel %vm448_vm0, %v2554_v10, 0  ;;  %v2580_v15 = vsel %vm448_vm0, %v2559_v11, 0  ;;  %vm306_vm5 = vsmask.f32 3328  ;;  %vm307_vm6 = vsmask.f32 7440  ;;  %s2848_s24 = scalar_lea.vmem %s3160_s3, %s2159_s17 }
  0x14   : > { %3181 = vst [vmem:[#allocation2_spill] sm:$0xff] %v2576_v14  ;;  %v2583_v16 = vld [vmem:[%s2564_s16 + $0x8] sm:$0xf]  ;;  %v2047_v17 = vld [vmem:[%s2564_s16 + $0xc] sm:$0x1]  ;;  %vm2685_vm7 = vmor %vm306_vm5, %vm307_vm6  ;;  %vm1791_vm8 = vcmask 1041408   ;;  %s3130_s8 = scalar_lea.vmem %s3162_s5, %s2159_s17 }
  0x15   : > { %3182 = vst [vmem:[#allocation3_spill] sm:$0xff] %v2583_v16  ;;  %v2587_v18 = vld [vmem:[%s2564_s16 + $0x10] sm:$0xf]  ;;  %v2049_v20 = vld [vmem:[%s2564_s16 + $0x14] sm:$0x1]  ;;  %v902_v23 = vshll.u32 %v2047_v17, 16 }
  0x16   : > { %3183 = vst [vmem:[#allocation4_spill] sm:$0xff] %v2587_v18  ;;  %v916_v26 = vshll.u32 %v2049_v20, 16  ;;  %v2080_v27 = vrot.slane %v2583_v16, 9  ;;  %v1116_v28 = vrot.slane %v2047_v17, 5  ;;  %v2602_v29 = vld [vmem:[%s2564_s16 + $0x18] sm:$0xf] }
  0x17   : > { %3186 = vst [vmem:[#allocation5_spill] sm:$0xff] %v2602_v29  ;;  %v2604_v30 = vrot.slane %v902_v23, 5  ;;  %v2081_v31 = vrot.slane %v2587_v18, 9  ;;  %v1120_v32 = vrot.slane %v2049_v20, 5  ;;  %v921_v33 = vshrl.u32 %v2602_v29, 16 }
  0x18   : > { %v2608_v34 = vrot.slane %v916_v26, 5  ;;  %v1117_v35 = vsel %vm2591_vm4, %v2080_v27, %v1116_v28  ;;  %v2051_v36 = vld [vmem:[%s2564_s16 + $0x1c] sm:$0x1]  ;;  %v2614_v37 = vld [vmem:[%s2564_s16 + $0x20] sm:$0xf]  ;;  %v924_v38 = vshll.u32 %v2602_v29, 16 }
  0x19   : > { %3187 = vst [vmem:[#allocation6_spill] sm:$0xff] %v2604_v30  ;;  %v1121_v40 = vsel %vm2591_vm4, %v2081_v31, %v1120_v32  ;;  %v2622_v41 = vld [vmem:[%s2564_s16 + $0x24] sm:$0x1]  ;;  %v2624_v42 = vrot.slane %v921_v33, 4  ;;  %v930_v43 = vshll.u32 %v2051_v36, 16  ;;  %v935_v44 = vshrl.u32 %v2614_v37, 16 }
  0x1a   : > { %3188 = vst [vmem:[#allocation7_spill] sm:$0xff] %v2608_v34  ;;  %v2089_v45 = vcombine.low %v1117_v35, %v1121_v40  ;;  %v2627_v46 = vrot.slane %v924_v38, 5  ;;  %v938_v47 = vshll.u32 %v2614_v37, 16  ;;  %v2631_v48 = vld [vmem:[%s2564_s16] sm:$0xf]  ;;  %v2082_v52 = vrot.slane %v2602_v29, 9 }
  0x1b   : > { %3189 = vst [vmem:[#allocation8_spill] sm:$0xff] %v2624_v42  ;;  %v2634_v49 = vld [vmem:[%s2564_s16 + $0x4] sm:$0x1]  ;;  %v2636_v50 = vrot.slane %v930_v43, 5  ;;  %v1124_v53 = vrot.slane %v2051_v36, 5  ;;  %v2644_v55 = vrot.slane %v935_v44, 4 }
  0x1c   : > { %3190 = vst [vmem:[#allocation9_spill] sm:$0xff] %v2627_v46  ;;  %v2641_v54 = vld [vmem:[%s2564_s16 + $0x8] sm:$0xf]  ;;  %2263 = vmatprep.mubr.msk.bf16.mxu0 %vm435_vm1, %v2089_v45  ;;  %v2646_v56 = vrot.slane %v938_v47, 5  ;;  %v2083_v57 = vrot.slane %v2614_v37, 9  ;;  %v1128_v58 = vrot.slane %v2622_v41, 5 }
  0x1d   : > { %3191 = vst [vmem:[#allocation10_spill] sm:$0xff] %v2636_v50  ;;  %3192 = vst [vmem:[#allocation11_spill] sm:$0xff] %v2644_v55  ;;  %v2651_v59 = vld [vmem:[%s2564_s16 + $0xc] sm:$0x1]  ;;  %v1125_v60 = vsel %vm2591_vm4, %v2082_v52, %v1124_v53  ;;  %v310_v61 = vshrl.u32 %v2631_v48, 16  ;;  %v313_v62 = vshll.u32 %v2631_v48, 16 }
  0x1e   : > { %3193 = vst [vmem:[#allocation12_spill] sm:$0xff] %v2646_v56  ;;  %v319_v63 = vshll.u32 %v2634_v49, 16  ;;  %v2659_v0 = vld [vmem:[%s2564_s16 + $0x10] sm:$0xf]  ;;  %v1129_v1 = vsel %vm2591_vm4, %v2083_v57, %v1128_v58  ;;  %v324_v2 = vshrl.u32 %v2641_v54, 16  ;;  %v327_v3 = vshll.u32 %v2641_v54, 16 }
  0x1f   : > { %v333_v4 = vshll.u32 %v2651_v59, 16  ;;  %v2667_v5 = vld [vmem:[%s2564_s16 + $0x14] sm:$0x1]  ;;  %v2090_v17 = vcombine.low %v1125_v60, %v1129_v1  ;;  %v312_v20 = vrot.slane %v310_v61, 4  ;;  %v315_v23 = vrot.slane %v313_v62, 5 }
  0x20   : > { %v321_v26 = vrot.slane %v319_v63, 5  ;;  %v2670_v27 = vld [vmem:[%s2564_s16 + $0x18] sm:$0xf]  ;;  %v326_v28 = vrot.slane %v324_v2, 4  ;;  %v329_v31 = vrot.slane %v327_v3, 5  ;;  %v338_v40 = vshrl.u32 %v2659_v0, 16 }
  0x21   : > { %v335_v32 = vrot.slane %v333_v4, 5  ;;  %v2674_v35 = vld [vmem:[%s2564_s16 + $0x1c] sm:$0x1]  ;;  %2264 = vmatmul.mubr.msk.bf16.vlgmr.msra.gmra.mrb[0].mxu0 %vm435_vm1, %v2090_v17  ;;  %v316_v36 = vor.u32 %v315_v23, %v312_v20  ;;  %v341_v43 = vshll.u32 %v2659_v0, 16  ;;  %v2681_v44 = vld [vmem:[%s2564_s16 + $0x28] sm:$0xf] }
  0x22   : > { %3194 = vst [vmem:[#allocation13_spill] sm:$0xff] %v2681_v44  ;;  %v330_v47 = vor.u32 %v329_v31, %v326_v28  ;;  %v347_v52 = vshll.u32 %v2667_v5, 16  ;;  %v352_v53 = vshrl.u32 %v2670_v27, 16  ;;  %v355_v57 = vshll.u32 %v2670_v27, 16  ;;  %v2693_v58 = vld [vmem:[%s2564_s16 + $0x2c] sm:$0x1]  ;;  %2272 = vmatpush3.bf16.msra.mxu0 %v2549_v9 }
  0x23   : > { %3197 = vst [vmem:[#allocation14_spill] sm:$0xff] %v2693_v58  ;;  %v317_v60 = vrot.slane %v316_v36, 4  ;;  %v340_v61 = vrot.slane %v338_v40, 4  ;;  %v343_v62 = vrot.slane %v341_v43, 5  ;;  %v361_v63 = vshll.u32 %v2674_v35, 16  ;;  %2398 = vmatprep.subr.msk.bf16.mxu0 %vm448_vm0, %v2543_v7 }
  0x24   : > { %v2698_v1 = vld [vmem:[%s2564_s16 + $0x30] sm:$0xf]  ;;  %v331_v2 = vrot.slane %v330_v47, 4  ;;  %v349_v3 = vrot.slane %v347_v52, 5  ;;  %v354_v4 = vrot.slane %v352_v53, 4  ;;  %v357_v17 = vrot.slane %v355_v57, 5 }
  0x25   : > { %3198 = vst [vmem:[#allocation15_spill] sm:$0xff] %v2698_v1  ;;  %v2703_v20 = vld [vmem:[%s2564_s16 + $0x34] sm:$0x1]  ;;  %v322_v9 = vsel %vm2685_vm7, %v317_v60, %v321_v26  ;;  %v344_v23 = vor.u32 %v343_v62, %v340_v61  ;;  %v363_v28 = vrot.slane %v361_v63, 5  ;;  %v2709_v36 = vld [vmem:[%s2564_s16 + $0x38] sm:$0xf] }
  0x26   : > { %3199 = vst [vmem:[#allocation16_spill] sm:$0xff] %v2703_v20  ;;  %3200 = vst [vmem:[#allocation17_spill] sm:$0xff] %v2709_v36  ;;  %v2712_v40 = vld [vmem:[%s2564_s16 + $0x3c] sm:$0x1]  ;;  %v336_v7 = vsel %vm2685_vm7, %v331_v2, %v335_v32  ;;  %v358_v43 = vor.u32 %v357_v17, %v354_v4  ;;  %v2084_v52 = vrot.slane %v2681_v44, 9  ;;  %v1132_v61 = vrot.slane %v2693_v58, 5 }
  0x27   : > { %3201 = vst [vmem:[#allocation18_spill] sm:$0xff] %v2712_v40  ;;  %v2719_v53 = vld [vmem:[%s2564_s16 + $0x40] sm:$0xf]  ;;  %v2722_v26 = vld [vmem:[%s2564_s16 + $0x44] sm:$0x1]  ;;  %v2013_v57 = vcombine.low %v322_v9, %v336_v7  ;;  %v345_v60 = vrot.slane %v344_v23, 4  ;;  %v2021_v58 = vcombine.low %v2631_v48, %v2641_v54 }
  0x28   : > { %3202 = vst [vmem:[#allocation19_spill] sm:$0xff] %v2719_v53  ;;  %3203 = vst [vmem:[#allocation20_spill] sm:$0xff] %v2722_v26  ;;  %v2085_v62 = vrot.slane %v2698_v1, 9  ;;  %v2727_v63 = vld [vmem:[%s2564_s16 + $0x20] sm:$0xf]  ;;  %v359_v32 = vrot.slane %v358_v43, 4  ;;  %v1133_v23 = vsel %vm2591_vm4, %v2084_v52, %v1132_v61 }
  0x29   : > { %v1136_v2 = vrot.slane %v2703_v20, 5  ;;  %v2086_v4 = vrot.slane %v2709_v36, 9  ;;  %v1140_v17 = vrot.slane %v2712_v40, 5  ;;  %2213 = vmatprep.mubr.msk.bf16.mxu1 %vm435_vm1, %v2013_v57  ;;  %v350_v9 = vsel %vm2685_vm7, %v345_v60, %v349_v3  ;;  %v2740_v39 = vld [vmem:[%s2564_s16 + $0x24] sm:$0x1]  ;;  %v3231_v19 = vld [vmem:[#allocation12_spill] sm:$0xff] }
  0x2a   : > { %v2087_v7 = vrot.slane %v2719_v53, 9  ;;  %v1144_v43 = vrot.slane %v2722_v26, 5  ;;  %v2743_v25 = vld [vmem:[%s2564_s16 + $0x28] sm:$0xf]  ;;  %v364_v24 = vsel %vm2685_vm7, %v359_v32, %v363_v28  ;;  %v2752_v52 = vld [vmem:[%s2564_s16 + $0x2c] sm:$0x1] }
  0x2b   : > { %v1137_v3 = vsel %vm2591_vm4, %v2085_v62, %v1136_v2  ;;  %v1141_v57 = vsel %vm2591_vm4, %v2086_v4, %v1140_v17  ;;  %v366_v60 = vshrl.u32 %v2727_v63, 16  ;;  %v2756_v61 = vld [vmem:[%s2564_s16 + $0x30] sm:$0xf]  ;;  %v2014_v22 = vcombine.low %v350_v9, %v364_v24  ;;  %v2762_v32 = vld [vmem:[%s2564_s16 + $0x34] sm:$0x1] }
  0x2c   : > { %v2091_v21 = vcombine.low %v1133_v23, %v1137_v3  ;;  %v1145_v51 = vsel %vm2591_vm4, %v2087_v7, %v1144_v43  ;;  %v369_v28 = vshll.u32 %v2727_v63, 16  ;;  %v2765_v62 = vld [vmem:[%s2564_s16 + $0x38] sm:$0xf]  ;;  %v375_v17 = vshll.u32 %v2740_v39, 16  ;;  %v2770_v31 = vld [vmem:[%s2564_s16 + $0x3c] sm:$0x1] }
  0x2d   : > { %v2092_v2 = vcombine.low %v1141_v57, %v1145_v51  ;;  %v368_v4 = vrot.slane %v366_v60, 4  ;;  %v380_v47 = vshrl.u32 %v2743_v25, 16  ;;  %2214 = vmatmul.mubr.msk.bf16.vlgmr.msra.gmra.mrb[0].mxu1 %vm435_vm1, %v2014_v22  ;;  %v383_v9 = vshll.u32 %v2743_v25, 16  ;;  %v2778_v51 = vld [vmem:[%s2564_s16 + $0x10] sm:$0xf] }
  0x2e   : > { %2267 = vmatprep.mubr.msk.bf16.mxu0 %vm435_vm1, %v2091_v21  ;;  %v371_v24 = vrot.slane %v369_v28, 5  ;;  %v389_v23 = vshll.u32 %v2752_v52, 16  ;;  %v394_v7 = vshrl.u32 %v2756_v61, 16  ;;  %2222 = vmatpush3.bf16.msra.mxu1 %v2546_v8  ;;  %v377_v43 = vrot.slane %v375_v17, 5  ;;  %v2785_v22 = vld [vmem:[%s2564_s16 + $0x18] sm:$0xf] }
  0x2f   : > { %2268 = vmatmul.mubr.msk.bf16.gmra.mrb[4].mxu0 %vm435_vm1, %v2092_v2  ;;  %v382_v3 = vrot.slane %v380_v47, 4  ;;  %v397_v57 = vshll.u32 %v2756_v61, 16  ;;  %v403_v21 = vshll.u32 %v2762_v32, 16  ;;  %v385_v28 = vrot.slane %v383_v9, 5  ;;  %2393 = vmatprep.subr.msk.bf16.mxu1 %vm448_vm0, %v2535_v6  ;;  %v2806_v34 = vld [vmem:[%s2564_s16 + $0x30] sm:$0xf] }
  0x30   : > { %v372_v60 = vor.u32 %v371_v24, %v368_v4  ;;  %v391_v38 = vrot.slane %v389_v23, 5  ;;  %v396_v33 = vrot.slane %v394_v7, 4  ;;  %v408_v2 = vshrl.u32 %v2765_v62, 16  ;;  %v2795_v24 = vld [vmem:[%s2564_s16 + $0x20] sm:$0xf] }
  0x31   : > { %v399_v8 = vrot.slane %v397_v57, 5  ;;  %v405_v26 = vrot.slane %v403_v21, 5  ;;  %v411_v47 = vshll.u32 %v2765_v62, 16  ;;  %v386_v40 = vor.u32 %v385_v28, %v382_v3  ;;  %v2799_v57 = vld [vmem:[%s2564_s16 + $0x28] sm:$0xf] }
  0x32   : > { %v373_v17 = vrot.slane %v372_v60, 4  ;;  %v417_v20 = vshll.u32 %v2770_v31, 16  ;;  %v2114_v4 = vcombine.low %v2778_v51, %v2785_v22  ;;  %v410_v6 = vrot.slane %v408_v2, 4  ;;  %v2811_v30 = vld [vmem:[%s2564_s16 + $0x38] sm:$0xf] }
  0x33   : > { %v400_v9 = vor.u32 %v399_v8, %v396_v33  ;;  %v413_v23 = vrot.slane %v411_v47, 5  ;;  %v1379_v7 = vshrl.u32 %v2778_v51, 16  ;;  %v387_v3 = vrot.slane %v386_v40, 4  ;;  %v2824_v50 = vld [vmem:[%s2564_s16 + $0x40] sm:$0xf] }
  0x34   : > { %v378_v21 = vsel %vm2685_vm7, %v373_v17, %v377_v43  ;;  %v419_v60 = vrot.slane %v417_v20, 5  ;;  %2273 = vmatprep.mubr.msk.bf16.mxu0 %vm435_vm1, %v2114_v4  ;;  %v1382_v28 = vshll.u32 %v2778_v51, 16  ;;  %v1393_v2 = vshrl.u32 %v2785_v22, 16  ;;  %v2858_v46 = vld [vmem:[%s2564_s16 + $0x24] sm:$0x1] }
  0x35   : > { %v401_v33 = vrot.slane %v400_v9, 4  ;;  %v414_v8 = vor.u32 %v413_v23, %v410_v6  ;;  %v1396_v47 = vshll.u32 %v2785_v22, 16  ;;  %v392_v20 = vsel %vm2685_vm7, %v387_v3, %v391_v38  ;;  %v2827_v38 = vld [vmem:[%s2564_s16 + $0x48] sm:$0xf] }
  0x36   : > { %v2115_v40 = vcombine.low %v2795_v24, %v2799_v57  ;;  %v1407_v43 = vshrl.u32 %v2795_v24, 16  ;;  %v1410_v17 = vshll.u32 %v2795_v24, 16  ;;  %v2015_v4 = vcombine.low %v378_v21, %v392_v20 }
  0x37   : > { %v406_v9 = vsel %vm2685_vm7, %v401_v33, %v405_v26  ;;  %v415_v6 = vrot.slane %v414_v8, 4  ;;  %v1421_v23 = vshrl.u32 %v2799_v57, 16  ;;  %v1424_v3 = vshll.u32 %v2799_v57, 16  ;;  %v2838_v33 = vld [vmem:[%s2564_s16 + $0x14] sm:$0x1] }
  0x38   : > { %2274 = vmatmul.mubr.msk.bf16.vlgmr.msra.gmra.mrb[0].mxu0 %vm435_vm1, %v2115_v40  ;;  %v2022_v21 = vcombine.low %v2659_v0, %v2670_v27  ;;  %v2116_v26 = vcombine.low %v2806_v34, %v2811_v30  ;;  %v2841_v8 = vld [vmem:[%s2564_s16 + $0x1c] sm:$0x1]  ;;  %2217 = vmatprep.mubr.msk.bf16.mxu1 %vm435_vm1, %v2015_v4  ;;  %v1438_v56 = vshll.u32 %v2806_v34, 16  ;;  %v1452_v18 = vshll.u32 %v2811_v30, 16 }
  0x39   : > { %v420_v20 = vsel %vm2685_vm7, %v415_v6, %v419_v60  ;;  %2282 = vmatpush3.bf16.msra.mxu0 %v2572_v13  ;;  %v2117_v4 = vcombine.low %v2824_v50, %v2827_v38  ;;  %v1381_v60 = vrot.slane %v1379_v7, 4  ;;  %v1384_v40 = vrot.slane %v1382_v28, 5 }
  0x3a   : > { %v2016_v42 = vcombine.low %v406_v9, %v420_v20  ;;  %2277 = vmatprep.mubr.msk.bf16.mxu0 %vm435_vm1, %v2116_v26  ;;  %2399 = vmatprep.subr.msk.bf16.mxu0 %vm448_vm0, %v2559_v11  ;;  %v2023_v9 = vcombine.low %v2727_v63, %v2743_v25  ;;  %v2873_v26 = vld [vmem:[%s2564_s16 + $0x2c] sm:$0x1]  ;;  %v1388_v11 = vshll.u32 %v2838_v33, 16  ;;  %v1395_v6 = vrot.slane %v1393_v2, 4 }
  0x3b   : > { %v1398_v55 = vrot.slane %v1396_v47, 5  ;;  %v1402_v13 = vshll.u32 %v2841_v8, 16  ;;  %v1409_v16 = vrot.slane %v1407_v43, 4  ;;  %v1385_v36 = vor.u32 %v1384_v40, %v1381_v60 }
  0x3c   : > { %2218 = vmatmul.mubr.msk.bf16.gmra.mrb[4].mxu1 %vm435_vm1, %v2016_v42  ;;  %v1390_v53 = vrot.slane %v1388_v11, 5  ;;  %v1412_v44 = vrot.slane %v1410_v17, 5  ;;  %v1416_v1 = vshll.u32 %v2858_v46, 16  ;;  %v1423_v29 = vrot.slane %v1421_v23, 4 }
  0x3d   : > { %2223 = vmatprep.mubr.msk.bf16.mxu1 %vm435_vm1, %v2021_v58  ;;  %v1399_v42 = vor.u32 %v1398_v55, %v1395_v6  ;;  %v1404_v14 = vrot.slane %v1402_v13, 5  ;;  %v1426_v20 = vrot.slane %v1424_v3, 5  ;;  %v1386_v7 = vrot.slane %v1385_v36, 4  ;;  %v2900_v36 = vld [vmem:[%s2564_s16 + $0x34] sm:$0x1] }
  0x3e   : > { %v1413_v58 = vor.u32 %v1412_v44, %v1409_v16  ;;  %v1418_v28 = vrot.slane %v1416_v1, 5  ;;  %v1430_v2 = vshll.u32 %v2873_v26, 16  ;;  %v2029_v40 = vrot.slane %v2631_v48, 9 }
  0x3f   : > { %v1400_v47 = vrot.slane %v1399_v42, 4  ;;  %v1427_v43 = vor.u32 %v1426_v20, %v1423_v29  ;;  %v2030_v17 = vrot.slane %v2641_v54, 9  ;;  %v1391_v55 = vsel %vm2685_vm7, %v1386_v7, %v1390_v53 }
  0x40   : > { %2278 = vmatmul.mubr.msk.bf16.gmra.mrb[4].mxu0 %vm435_vm1, %v2117_v4  ;;  %v1414_v23 = vrot.slane %v1413_v58, 4  ;;  %v1432_v3 = vrot.slane %v1430_v2, 5  ;;  %v2031_v4 = vrot.slane %v2659_v0, 9  ;;  %v3204_v1 = vrot.slane %v2634_v49, 5  ;;  %v2928_v58 = vld [vmem:[%s2564_s16 + $0x44] sm:$0x1] }
  0x41   : > { %v1405_v16 = vsel %vm2685_vm7, %v1400_v47, %v1404_v14  ;;  %v1428_v44 = vrot.slane %v1427_v43, 4  ;;  %v3205_v48 = vrot.slane %v2651_v59, 5  ;;  %v3206_v49 = vrot.slane %v2667_v5, 5  ;;  %v2912_v59 = vld [vmem:[%s2564_s16 + $0x3c] sm:$0x1] }
  0x42   : > { %v631_v29 = vsel %vm2591_vm4, %v2029_v40, %v3204_v1  ;;  %v2123_v53 = vcombine.low %v1391_v55, %v1405_v16  ;;  %v1419_v0 = vsel %vm2685_vm7, %v1414_v23, %v1418_v28  ;;  %v2032_v6 = vrot.slane %v2670_v27, 9  ;;  %v2938_v47 = vld [vmem:[%s2564_s16 + $0x4c] sm:$0x1] }
  0x43   : > { %v635_v54 = vsel %vm2591_vm4, %v2030_v17, %v3205_v48  ;;  %v2909_v60 = vsel %vm2591_vm4, %v2031_v4, %v3206_v49  ;;  %v3207_v13 = vshrl.u32 %v2806_v34, 16  ;;  %v1440_v5 = vrot.slane %v1438_v56, 5 }
  0x44   : > { %2224 = vmatmul.mubr.msk.bf16.vlgmr.msra.gmra.mrb[0].mxu1 %vm435_vm1, %v2022_v21  ;;  %v2038_v14 = vcombine.low %v631_v29, %v635_v54  ;;  %v1433_v21 = vsel %vm2685_vm7, %v1428_v44, %v1432_v3  ;;  %2283 = vmatprep.mubr.msk.bf16.mxu0 %vm435_vm1, %v2123_v53  ;;  %v3208_v42 = vshrl.u32 %v2811_v30, 16  ;;  %v1454_v7 = vrot.slane %v1452_v18, 5  ;;  %v2945_v18 = vld [vmem:[%s3161_s4] sm:$0x3] }
  0x45   : > { %2232 = vmatpush3.bf16.msra.mxu1 %v2568_v12  ;;  %2227 = vmatprep.mubr.msk.bf16.mxu1 %vm435_vm1, %v2023_v9  ;;  %v1437_v20 = vrot.slane %v3207_v13, 4  ;;  %v2124_v11 = vcombine.low %v1419_v0, %v1433_v21  ;;  %v1444_v12 = vshll.u32 %v2900_v36, 16  ;;  %v3209_v27 = vrot.slane %v2674_v35, 5 }
  0x46   : > { %2394 = vmatprep.subr.msk.bf16.mxu1 %vm448_vm0, %v2554_v10  ;;  %v1451_v9 = vrot.slane %v3208_v42, 4  ;;  %v1458_v2 = vshll.u32 %v2912_v59, 16  ;;  %v3210_v10 = vshrl.u32 %v2824_v50, 16  ;;  %v3211_v55 = vshll.u32 %v2824_v50, 16 }
  0x47   : > { %v2934_v28 = vsel %vm2591_vm4, %v2032_v6, %v3209_v27  ;;  %v1441_v56 = vor.u32 %v1440_v5, %v1437_v20  ;;  %v1446_v40 = vrot.slane %v1444_v12, 5  ;;  %v1472_v16 = vshll.u32 %v2928_v58, 16 }
  0x48   : > { %v1465_v43 = vrot.slane %v3210_v10, 4  ;;  %2284 = vmatmul.mubr.msk.bf16.vlgmr.msra.gmra.mrb[0].mxu0 %vm435_vm1, %v2124_v11  ;;  %v2039_v35 = vcombine.low %v2909_v60, %v2934_v28  ;;  %v1455_v17 = vor.u32 %v1454_v7, %v1451_v9  ;;  %v1468_v23 = vrot.slane %v3211_v55, 5 }
  0x49   : > { %v1442_v3 = vrot.slane %v1441_v56, 4  ;;  %v1460_v4 = vrot.slane %v1458_v2, 5  ;;  %v3212_v44 = vshrl.u32 %v2827_v38, 16  ;;  %2292 = vmatpush3.bf16.msra.mxu0 %v2580_v15  ;;  %v3213_v54 = vshll.u32 %v2827_v38, 16 }
  0x4a   : > { %v1456_v29 = vrot.slane %v1455_v17, 4  ;;  %v1469_v48 = vor.u32 %v1468_v23, %v1465_v43  ;;  %v1486_v0 = vshll.u32 %v2938_v47, 16  ;;  %2400 = vmatprep.subr.msk.bf16.mxu0 %vm1791_vm8, %v2945_v18  ;;  %v1474_v60 = vrot.slane %v1472_v16, 5 }
  0x4b   : > { %v1479_v1 = vrot.slane %v3212_v44, 4  ;;  %v1482_v53 = vrot.slane %v3213_v54, 5  ;;  %v1447_v49 = vsel %vm2685_vm7, %v1442_v3, %v1446_v40  ;;  %v2033_v21 = vrot.slane %v2727_v63, 9 }
  0x4c   : > { %v646_v6 = vrot.slane %v2740_v39, 5  ;;  %v3214_v15 = vcombine.low %v2756_v61, %v2765_v62  ;;  %v1461_v13 = vsel %vm2685_vm7, %v1456_v29, %v1460_v4  ;;  %v1470_v20 = vrot.slane %v1469_v48, 4  ;;  %v3216_v4 = vld [vmem:[#allocation5_spill] sm:$0xff] }
  0x4d   : > { %v1483_v5 = vor.u32 %v1482_v53, %v1479_v1  ;;  %v1488_v11 = vrot.slane %v1486_v0, 5  ;;  %v2125_v12 = vcombine.low %v1447_v49, %v1461_v13  ;;  %v2034_v63 = vrot.slane %v2743_v25, 9 }
  0x4e   : > { %2228 = vmatmul.mubr.msk.bf16.gmra.mrb[4].mxu1 %vm435_vm1, %v3214_v15  ;;  %v647_v42 = vsel %vm2591_vm4, %v2033_v21, %v646_v6  ;;  %v650_v39 = vrot.slane %v2752_v52, 5  ;;  %v1475_v9 = vsel %vm2685_vm7, %v1470_v20, %v1474_v60  ;;  %v2035_v27 = vrot.slane %v2756_v61, 9  ;;  %v3219_v6 = vld [vmem:[#allocation13_spill] sm:$0xff]  ;;  %v3220_v15 = vld [vmem:[#allocation19_spill] sm:$0xff] }
  0x4f   : > { %2233 = vmatprep.mubr.msk.bf16.mxu1 %vm435_vm1, %v2038_v14  ;;  %v1484_v7 = vrot.slane %v1483_v5, 4  ;;  %v654_v28 = vrot.slane %v2762_v32, 5  ;;  %2287 = vmatprep.mubr.msk.bf16.mxu0 %vm435_vm1, %v2125_v12  ;;  %v2036_v56 = vrot.slane %v2765_v62, 9  ;;  %v658_v2 = vrot.slane %v2770_v31, 5  ;;  %v3222_v5 = vld [vmem:[#allocation3_spill] sm:$0xff] }
  0x50   : > { %v651_v14 = vsel %vm2591_vm4, %v2034_v63, %v650_v39  ;;  %v2131_v25 = vrot.slane %v2778_v51, 9  ;;  %v1602_v32 = vrot.slane %v2838_v33, 5  ;;  %v2132_v17 = vrot.slane %v2785_v22, 9 }
  0x51   : > { %v1489_v52 = vsel %vm2685_vm7, %v1484_v7, %v1488_v11  ;;  %v2040_v10 = vcombine.low %v647_v42, %v651_v14  ;;  %v655_v61 = vsel %vm2591_vm4, %v2035_v27, %v654_v28  ;;  %v659_v40 = vsel %vm2591_vm4, %v2036_v56, %v658_v2  ;;  %v3225_v42 = vld [vmem:[#allocation4_spill] sm:$0xff]  ;;  %v3229_v14 = vld [vmem:[#allocation9_spill] sm:$0xff]  ;;  %v3230_v2 = vld [vmem:[#allocation11_spill] sm:$0xff] }
  0x52   : > { %v2126_v43 = vcombine.low %v1475_v9, %v1489_v52  ;;  %v1606_v62 = vrot.slane %v2841_v8, 5  ;;  %v3215_v31 = vshll.u32 %v2622_v41, 16  ;;  %v1603_v55 = vsel %vm2591_vm4, %v2131_v25, %v1602_v32  ;;  %v3011_v41 = vld [vmem:[%s3158_s1 + $0x10] sm:$0xf]  ;;  %v3232_v32 = vld [vmem:[#allocation14_spill] sm:$0xff] }
  0x53   : > { %v2133_v23 = vrot.slane %v2795_v24, 9  ;;  %v1610_v3 = vrot.slane %v2858_v46, 5  ;;  %v2134_v22 = vrot.slane %v2799_v57, 9  ;;  %v1614_v8 = vrot.slane %v2873_v26, 5  ;;  %v3217_v57 = vld [vmem:[#allocation2_spill] sm:$0xff]  ;;  %v3228_v28 = vld [vmem:[#allocation8_spill] sm:$0xff] }
  0x54   : > { %v2997_v51 = vrot.slane %v3215_v31, 5  ;;  %2288 = vmatmul.mubr.msk.bf16.gmra.mrb[4].mxu0 %vm435_vm1, %v2126_v43  ;;  %v1607_v33 = vsel %vm2591_vm4, %v2132_v17, %v1606_v62  ;;  %v2064_v16 = vcombine.low %v3216_v4, %v2614_v37  ;;  %v2041_v46 = vcombine.low %v655_v61, %v659_v40 }
  0x55   : > { %v2140_v24 = vcombine.low %v1603_v55, %v1607_v33  ;;  %v1611_v44 = vsel %vm2591_vm4, %v2133_v23, %v1610_v3  ;;  %v2135_v1 = vrot.slane %v2806_v34, 9  ;;  %v1615_v26 = vsel %vm2591_vm4, %v2134_v22, %v1614_v8 }
  0x56   : > { %2234 = vmatmul.mubr.msk.bf16.vlgmr.msra.gmra.mrb[0].mxu1 %vm435_vm1, %v2039_v35  ;;  %v1618_v29 = vrot.slane %v2900_v36, 5  ;;  %v2136_v48 = vrot.slane %v2811_v30, 9  ;;  %v1622_v35 = vrot.slane %v2912_v59, 5  ;;  %v2141_v54 = vcombine.low %v1611_v44, %v1615_v26 }
  0x57   : > { %2242 = vmatpush3.bf16.msra.mxu1 %v3217_v57  ;;  %2237 = vmatprep.mubr.msk.bf16.mxu1 %vm435_vm1, %v2040_v10  ;;  %v2137_v34 = vrot.slane %v2824_v50, 9  ;;  %v1626_v53 = vrot.slane %v2928_v58, 5  ;;  %v2138_v0 = vrot.slane %v2827_v38, 9  ;;  %v1630_v36 = vrot.slane %v2938_v47, 5  ;;  %v3218_v50 = vld [vmem:[#allocation15_spill] sm:$0xff]  ;;  %v3221_v38 = vld [vmem:[#allocation17_spill] sm:$0xff] }
  0x58   : > { %2293 = vmatprep.mubr.msk.bf16.mxu0 %vm435_vm1, %v2140_v24  ;;  %2395 = vmatprep.subr.msk.bf16.mxu1 %vm448_vm0, %v3011_v41  ;;  %v1619_v49 = vsel %vm2591_vm4, %v2135_v1, %v1618_v29  ;;  %v1623_v30 = vsel %vm2591_vm4, %v2136_v48, %v1622_v35  ;;  %v1793_v59 = vsel %vm1791_vm8, %v2945_v18, 0  ;;  %v2065_v58 = vcombine.low %v3219_v6, %v3218_v50  ;;  %v3235_v57 = vld [vmem:[#allocation6_spill] sm:$0xff] }
  0x59   : > { %v2142_v60 = vcombine.low %v1619_v49, %v1623_v30  ;;  %v1627_v21 = vsel %vm2591_vm4, %v2137_v34, %v1626_v53  ;;  %v2066_v13 = vcombine.low %v3221_v38, %v3220_v15  ;;  %v1631_v20 = vsel %vm2591_vm4, %v2138_v0, %v1630_v36  ;;  %v3236_v34 = vld [vmem:[#allocation7_spill] sm:$0xff]  ;;  %v3237_v0 = vld [vmem:[#allocation16_spill] sm:$0xff] }
  0x5a   : > { %vm1778_vm9 = vcmask 31744   ;;  %v3223_v11 = vshrl.u32 %v3222_v5, 16  ;;  %v3224_v12 = vshll.u32 %v3222_v5, 16  ;;  %v3226_v63 = vshrl.u32 %v3225_v42, 16 }
  0x5b   : > { %v2143_v9 = vcombine.low %v1627_v21, %v1631_v20  ;;  %v3227_v7 = vshll.u32 %v3225_v42, 16  ;;  %v927_v56 = vor.u32 %v3229_v14, %v3228_v28  ;;  %v941_v25 = vor.u32 %v3231_v19, %v3230_v2  ;;  %v3238_v21 = vld [vmem:[#allocation18_spill] sm:$0xff]  ;;  %v2440_v2 = vld [vmem:[%s2848_s24 + $0x10] sm:$0xff]  }
  0x5c   : > { %v895_v47 = vrot.slane %v3223_v11, 4  ;;  %v898_v18 = vrot.slane %v3224_v12, 5  ;;  %v909_v39 = vrot.slane %v3226_v63, 4  ;;  %2294 = vmatmul.mubr.msk.bf16.vlgmr.msra.gmra.mrb[0].mxu0 %vm435_vm1, %v2141_v54  ;;  %v949_v10 = vshrl.u32 %v3219_v6, 16  ;;  %v2438_v54 = vld [vmem:[%s2848_s24] sm:$0xff]  }
  0x5d   : > { %v912_v27 = vrot.slane %v3227_v7, 5  ;;  %v952_v61 = vshll.u32 %v3219_v6, 16  ;;  %v958_v43 = vshll.u32 %v3232_v32, 16  ;;  %2297 = vmatprep.mubr.msk.bf16.mxu0 %vm435_vm1, %v2142_v60  ;;  %v928_v17 = vrot.slane %v927_v56, 4  ;;  %2302 = vmatpush3.bf16.msra.mxu0 %v1793_v59  ;;  %v2439_v56 = vld [vmem:[%s2848_s24 + $0x8] sm:$0xff]  }
  0x5e   : > { %v899_v52 = vor.u32 %v898_v18, %v895_v47  ;;  %2238 = vmatmul.mubr.msk.bf16.gmra.mrb[4].mxu1 %vm435_vm1, %v2041_v46  ;;  %v942_v62 = vrot.slane %v941_v25, 4  ;;  %v963_v31 = vshrl.u32 %v3218_v50, 16  ;;  %v3233_v55 = vcombine.low %v3222_v5, %v3225_v42  ;;  %v3234_v46 = vld [vmem:[#allocation10_spill] sm:$0xff] }
  0x5f   : > { %v913_v40 = vor.u32 %v912_v27, %v909_v39  ;;  %v951_v3 = vrot.slane %v949_v10, 4  ;;  %v954_v33 = vrot.slane %v952_v61, 5  ;;  %v960_v22 = vrot.slane %v958_v43, 5  ;;  %v2441_v61 = vld [vmem:[%s2848_s24 + $0x18] sm:$0xff]  }
  0x60   : > { %2243 = vmatprep.mubr.msk.bf16.mxu1 %vm435_vm1, %v3233_v55  ;;  %v900_v23 = vrot.slane %v899_v52, 4  ;;  %v933_v24 = vsel %vm2685_vm7, %v928_v17, %v3234_v46  ;;  %v947_v44 = vsel %vm2685_vm7, %v942_v62, %v2997_v51  ;;  %v965_v1 = vrot.slane %v963_v31, 4 }
  0x61   : > { %v914_v8 = vrot.slane %v913_v40, 4  ;;  %v2073_v29 = vcombine.low %v933_v24, %v947_v44  ;;  %v955_v48 = vor.u32 %v954_v33, %v951_v3  ;;  %v966_v35 = vshll.u32 %v3218_v50, 16 }
  0x62   : > { %v905_v26 = vsel %vm2685_vm7, %v900_v23, %v3235_v57  ;;  %v972_v49 = vshll.u32 %v3237_v0, 16  ;;  %v977_v30 = vshrl.u32 %v3221_v38, 16  ;;  %v980_v51 = vshll.u32 %v3221_v38, 16  ;;  %v2148_v38 = vld [vmem:[%s3159_s2] ss:$0 sm:$0xff] }
  0x63   : > { %v919_v53 = vsel %vm2685_vm7, %v914_v8, %v3236_v34  ;;  %v956_v59 = vrot.slane %v955_v48, 4  ;;  %v968_v60 = vrot.slane %v966_v35, 5  ;;  %v986_v6 = vshll.u32 %v3238_v21, 16 }
  0x64   : > { %v2072_v36 = vcombine.low %v905_v26, %v919_v53  ;;  %v1031_v20 = vsel %vm448_vm0, %v3011_v41, 0  ;;  %v979_v50 = vrot.slane %v977_v30, 4  ;;  %v982_v5 = vrot.slane %v980_v51, 5  ;;  %2298 = vmatmul.mubr.msk.bf16.gmra.mrb[4].mxu0 %vm435_vm1, %v2143_v9  ;;  %v3239_v9 = vld [vmem:[#allocation20_spill] sm:$0xff] }
  0x65   : > { %v991_v11 = vshrl.u32 %v3220_v15, 16  ;;  %v961_v47 = vsel %vm2685_vm7, %v956_v59, %v960_v22  ;;  %v969_v12 = vor.u32 %v968_v60, %v965_v1  ;;  %v974_v18 = vrot.slane %v972_v49, 5  ;;  %2303 = vmatprep.mubr.msk.bf16.mxu0 %vm1778_vm9, %v2438_v54 }
  0x66   : > { %v994_v42 = vshll.u32 %v3220_v15, 16  ;;  %2244 = vmatmul.mubr.msk.bf16.vlgmr.msra.gmra.mrb[0].mxu1 %vm435_vm1, %v2064_v16  ;;  %v983_v41 = vor.u32 %v982_v5, %v979_v50  ;;  %v988_v63 = vrot.slane %v986_v6, 5  ;;  %v1000_v7 = vshll.u32 %v3239_v9, 16 }
  0x67   : > { %v993_v39 = vrot.slane %v991_v11, 4  ;;  %2252 = vmatpush3.bf16.msra.mxu1 %v1031_v20  ;;  %2247 = vmatprep.mubr.msk.bf16.mxu1 %vm435_vm1, %v2065_v58  ;;  %v970_v27 = vrot.slane %v969_v12, 4  ;;  %vm1884_vm10 = vcmask 60416  }
  0x68   : > { %v996_v28 = vrot.slane %v994_v42, 5  ;;  %v984_v14 = vrot.slane %v983_v41, 4  ;;  %v1002_v16 = vrot.slane %v1000_v7, 5 }
  0x69   : > { %v975_v37 = vsel %vm2685_vm7, %v970_v27, %v974_v18 }
  0x6a   : > { %v997_v4 = vor.u32 %v996_v28, %v993_v39  ;;  %v2074_v19 = vcombine.low %v961_v47, %v975_v37  ;;  %v989_v25 = vsel %vm2685_vm7, %v984_v14, %v988_v63 }
  0x6c   : > { %v998_v52 = vrot.slane %v997_v4, 4  ;;  %2304 = vmatmul.mubr.msk.bf16.vlgmr.msra.gmra.mrb[0].mxu0 %vm1778_vm9, %v2439_v56 }
  0x6d   : > { %2307 = vmatprep.mubr.msk.bf16.mxu0 %vm1778_vm9, %v2440_v2 }
  0x6e   : > { %v1003_v58 = vsel %vm2685_vm7, %v998_v52, %v1002_v16  ;;  %2248 = vmatmul.mubr.msk.bf16.gmra.mrb[4].mxu1 %vm435_vm1, %v2066_v13 }
  0x6f   : > { %v2075_v10 = vcombine.low %v989_v25, %v1003_v58  ;;  %2253 = vmatprep.mubr.msk.bf16.mxu1 %vm435_vm1, %v2072_v36 }
  0x74   : > { %2308 = vmatmul.mubr.msk.bf16.gmra.mrb[4].mxu0 %vm1778_vm9, %v2441_v61 }
  0x76   : > { %2254 = vmatmul.mubr.msk.bf16.vlgmr.msra.gmra.mrb[0].mxu1 %vm435_vm1, %v2073_v29 }
  0x77   : > { %2257 = vmatprep.mubr.msk.bf16.mxu1 %vm435_vm1, %v2074_v19 }
  0x7e   : > { %2258 = vmatmul.mubr.msk.bf16.gmra.mrb[4].mxu1 %vm435_vm1, %v2075_v10 }
 0x13f   : > { %v2305_v45 = vpop.f32.mrb[0].mxu0 }
 0x140   : > { %v1829_v32 = vpop.f32.mrb[1].mxu0 }
 0x141   : > { %v2306_v43 = vpop.f32.mrb[2].mxu0 }
 0x142   : > { %v1832_v15 = vpop.f32.mrb[3].mxu0 }
 0x147   : > { %v2309_v13 = vpop.f32.mrb[4].mxu0 }
 0x148   : > { %v1845_v17 = vpop.f32.mrb[5].mxu0 }
 0x149   : > { %v2255_v40 = vpop.f32.mrb[0].mxu1  ;;  %v2310_v55 = vpop.f32.mrb[6].mxu0 }
 0x14a   : > { %v2311_v62 = vadd.f32 %v2255_v40, %v2148_v38  ;;  %v1067_v31 = vpop.f32.mrb[1].mxu1  ;;  %v1848_v33 = vpop.f32.mrb[7].mxu0 }
 0x14b   : > { %v2313_v23 = vadd.f32 %v2148_v38, %v1067_v31  ;;  %v2256_v3 = vpop.f32.mrb[2].mxu1 }
 0x14c   : > { %v2312_v22 = vadd.f32 %v2311_v62, %v2305_v45  ;;  %v2315_v8 = vadd.f32 %v2256_v3, %v2148_v38  ;;  %v1070_v46 = vpop.f32.mrb[3].mxu1 }
 0x14d   : > { %v2314_v24 = vadd.f32 %v2313_v23, %v1829_v32  ;;  %v2317_v44 = vadd.f32 %v2148_v38, %v1070_v46 }
 0x14e   : > { %v1870_v1 = vmax.f32 %v2312_v22, 0.0  ;;  %v2316_v57 = vadd.f32 %v2315_v8, %v2306_v43 }
 0x14f   : > { %v1868_v26 = vmax.f32 %v2314_v24, 0.0  ;;  %v2318_v29 = vadd.f32 %v2317_v44, %v1832_v15 }
 0x150   : > { %v1878_v48 = vpack.c.bf16 %v1870_v1, %v1870_v1  ;;  %v1871_v35 = vmax.f32 %v2316_v57, 0.0 }
 0x151   : > { %v1876_v54 = vpack.c.bf16 %v1868_v26, %v1868_v26  ;;  %v1869_v34 = vmax.f32 %v2318_v29, 0.0  ;;  %v2259_v53 = vpop.f32.mrb[4].mxu1 }
 0x152   : > { %1887 = vst.msk [vmem:[%s3130_s8 + $0x8] sm:$0xf] %vm1884_vm10, %v1878_v48  ;;  %v1879_v0 = vpack.c.bf16 %v1871_v35, %v1871_v35  ;;  %v2319_v49 = vadd.f32 %v2259_v53, %v2148_v38  ;;  %v1083_v30 = vpop.f32.mrb[5].mxu1 }
 0x153   : > { %1885 = vst.msk [vmem:[%s3130_s8] sm:$0xf] %vm1884_vm10, %v1876_v54  ;;  %v1877_v51 = vpack.c.bf16 %v1869_v34, %v1869_v34  ;;  %v2321_v36 = vadd.f32 %v2148_v38, %v1083_v30  ;;  %v2260_v59 = vpop.f32.mrb[6].mxu1 }
 0x154   : > { %1888 = vst.msk [vmem:[%s3130_s8 + $0xc] sm:$0xf] %vm1884_vm10, %v1879_v0  ;;  %v2320_v60 = vadd.f32 %v2319_v49, %v2309_v13  ;;  %v2323_v21 = vadd.f32 %v2260_v59, %v2148_v38  ;;  %v1086_v6 = vpop.f32.mrb[7].mxu1 }
 0x155   : > { %1886 = vst.msk [vmem:[%s3130_s8 + $0x4] sm:$0xf] %vm1884_vm10, %v1877_v51  ;;  %v2322_v20 = vadd.f32 %v2321_v36, %v1845_v17  ;;  %v2325_v50 = vadd.f32 %v2148_v38, %v1086_v6 }
 0x156   : > { %v1874_v5 = vmax.f32 %v2320_v60, 0.0  ;;  %v2324_v11 = vadd.f32 %v2323_v21, %v2310_v55 }
 0x157   : > { %v1872_v47 = vmax.f32 %v2322_v20, 0.0  ;;  %v2326_v12 = vadd.f32 %v2325_v50, %v1848_v33 }
 0x158   : > { %v1882_v18 = vpack.c.bf16 %v1874_v5, %v1874_v5  ;;  %v1875_v42 = vmax.f32 %v2324_v11, 0.0 }
 0x159   : > { %v1880_v41 = vpack.c.bf16 %v1872_v47, %v1872_v47  ;;  %v1873_v63 = vmax.f32 %v2326_v12, 0.0 }
 0x15a   : > { %1891 = vst.msk [vmem:[%s3130_s8 + $0x18] sm:$0xf] %vm1884_vm10, %v1882_v18  ;;  %v1883_v39 = vpack.c.bf16 %v1875_v42, %v1875_v42 }
 0x15b   : > { %1889 = vst.msk [vmem:[%s3130_s8 + $0x10] sm:$0xf] %vm1884_vm10, %v1880_v41  ;;  %v1881_v9 = vpack.c.bf16 %v1873_v63, %v1873_v63 }
 0x15c   : > { %1892 = vst.msk [vmem:[%s3130_s8 + $0x1c] sm:$0xf] %vm1884_vm10, %v1883_v39 }
 0x15d   : > { %1890 = vst.msk [vmem:[%s3130_s8 + $0x14] sm:$0xf] %vm1884_vm10, %v1881_v9 }
 0x15e PF: > { %s15_s20 = sadd.s32 1, %s2464_s20   ;;  %s3240_s18 = smov %s2460_s19 }
 0x15f   : > { %p12_p5 = scmp.ge.s32.totalorder %s15_s20, 4   ;;  %s3241_s19 = smov %s3243_s21 }
 0x161   :  { %14 = sbr.rel (!%p12_p5) target bundleno = 2 (0x2), region = 84 }

// kernel: basic_block_forward.2
= control target key start
LH: loop header
LB: loop body
LE: loop exit
PB: predicated region body
PF: predicated region fallthrough
CT: control target
= control target key end

     0   :  { %s2143_s12 = smov 0   ;;  %s2145_s13 = smov 0   ;;  %s2591_s0 = inlined_call_operand.vmem [shape: bf16[2,2,9,2,9,4], index: 0, kind: input, shape index: {}]   ;;  %s2592_s1 = inlined_call_operand.vmem [shape: bf16[9,4,8], index: 1, kind: input, shape index: {}]   ;;  %s2593_s2 = inlined_call_operand.vmem [shape: f32[1,8], index: 2, kind: input, shape index: {}]   ;;  %s2594_s3 = inlined_call_operand.vmem [shape: bf16[2,8,8,8], index: 3, kind: output, shape index: {}]  }
   0x1   :  { %s2147_s14 = smov 0  }
   0x2 LB: > { %s25_s15 = sadd.s32 1, %s2117_s13  ;;  %p1703_p0 = scmp.ge.s32.totalorder %s2121_s14, 1  ;;  %s2121_s14 = sphi %s2147_s14, %s13_s14   ;;  %s2117_s13 = sphi %s2145_s13, %s2598_s13   ;;  %s2113_s12 = sphi %s2143_s12, %s2597_s12  }
   0x3   : > { %p27_p1 = scmp.ge.s32.totalorder %s25_s15, 2  ;;  %p151_p2 = scmp.lt.s32.totalorder %s2121_s14, 3 }
   0x5   : > { %s2600_s15 = smov (%p27_p1, %s25_s15), 0  ;;  %p152_p3 = pnand %p1703_p0, %p151_p2 }
   0x6   : > { %v1707_v0 = vld [vmem:[%s2592_s1 + $0x2] sm:$0x3] (!%p152_p3)  ;;  %vm259_vm0 = vcmask (!%p152_p3), 1041408   ;;  %v2167_v1 = vld [vmem:[%s2592_s1 + $0x8] sm:$0x3] (!%p152_p3)  ;;  %p179_p4 = scmp.lt.s32.totalorder (!%p152_p3), %s2113_s12, 1 }
   0x7   : > { %155 = sbr.rel (%p152_p3) target bundleno = 325 (0x145), region = 32  ;;  %2040 = vmatprep.subr.msk.bf16.mxu1 (!%p152_p3), %vm259_vm0, %v1707_v0  ;;  %2044 = vmatprep.subr.msk.bf16.mxu0 (!%p152_p3), %vm259_vm0, %v2167_v1  ;;  %v261_v2 = vsel (!%p152_p3), %vm259_vm0, %v1707_v0, 0  ;;  %v2175_v3 = vsel (!%p152_p3), %vm259_vm0, %v2167_v1, 0  ;;  %v223_v4 = vld [vmem:[%s2592_s1] sm:$0x3] (!%p152_p3)  ;;  %vm246_vm1 = vcmask (!%p152_p3), 31744  }
   0x8   : > { %1885 = vmatpush3.bf16.msra.mxu1 (!%p152_p3), %v261_v2  ;;  %1925 = vmatpush3.bf16.msra.mxu0 (!%p152_p3), %v2175_v3  ;;  %v1775_v5 = vld [vmem:[%s2592_s1 + $0xa] sm:$0x3] (!%p152_p3)  ;;  %v361_v6 = vsel (!%p152_p3), %vm259_vm0, %v223_v4, 0  ;;  %v1808_v9 = vld [vmem:[%s2592_s1 + $0xc] sm:$0x3] (!%p152_p3)  ;;  %vm1599_vm5 = vcmask (!%p152_p3), 60416  }
   0x9   : > { %2041 = vmatprep.subr.msk.bf16.mxu1 (!%p152_p3), %vm259_vm0, %v223_v4  ;;  %2046 = vmatprep.subr.msk.bf16.mxu0 (!%p152_p3), %vm259_vm0, %v1775_v5  ;;  %v1031_v7 = vsel (!%p152_p3), %vm259_vm0, %v1775_v5, 0  ;;  %vm428_vm2 = vsmask.f32 (!%p152_p3), 3328  ;;  %vm429_vm3 = vsmask.f32 (!%p152_p3), 7440  ;;  %v2214_v15 = vsel (!%p152_p3), %vm259_vm0, %v1808_v9, 0 }
   0xa   : > { %v2206_v12 = vld [vmem:[%s2592_s1 + $0x4] sm:$0x3] (!%p152_p3)  ;;  %vm2249_vm4 = vmor (!%p152_p3), %vm428_vm2, %vm429_vm3  ;;  %v2257_v54 = vld [vmem:[%s2592_s1 + $0xe] sm:$0x3] (!%p152_p3) }
   0xb   : > { %v1757_v59 = vld [vmem:[%s2592_s1 + $0x6] sm:$0x3] (!%p152_p3)  ;;  %v2265_v60 = vld [vmem:[%s2592_s1 + $0x10] sm:$0x3] (!%p152_p3) }
   0xe   : > { %s2602_s12 = smov (!%p179_p4, %s2113_s12), 1 }
   0xf   : > { %s2050_s24 = smul.u32 288, %s2602_s12  ;;  %s1838_s17 = sshll.u32 %s2602_s12, 5 }
  0x10   : > { %s2564_s20 = scalar_lea.vmem %s2594_s3, %s1838_s17 }
  0x11   : > { %s2192_s27 = scalar_lea.vmem %s2591_s0, %s2050_s24 }
  0x12   : > { %v2075_v8 = vld [vmem:[%s2192_s27 + $0x8] ss:$16 sps:$4 sm:$0xff]   ;;  %v2219_v17 = vld [vmem:[%s2192_s27 + $0x90] sm:$0xf]  ;;  %v1734_v18 = vld [vmem:[%s2192_s27 + $0x94] sm:$0x1] }
  0x13   : > { %v2076_v10 = vld [vmem:[%s2192_s27 + $0x98] ss:$16 sps:$4 sm:$0xff]   ;;  %1886 = vmatprep.mubr.msk.bf16.mxu1 %vm246_vm1, %v2075_v8  ;;  %v2223_v19 = vld [vmem:[%s2192_s27 + $0xa0] sm:$0xf]  ;;  %v1737_v20 = vld [vmem:[%s2192_s27 + $0xa4] sm:$0x1] }
  0x14   : > { %v2077_v11 = vld [vmem:[%s2192_s27 + $0x28] ss:$16 sps:$4 sm:$0xff]   ;;  %1926 = vmatprep.mubr.msk.bf16.mxu0 %vm246_vm1, %v2076_v10  ;;  %v893_v21 = vshrl.u32 %v2219_v17, 16  ;;  %v896_v22 = vshll.u32 %v2219_v17, 16  ;;  %v902_v23 = vshll.u32 %v1734_v18, 16  ;;  %v907_v24 = vshrl.u32 %v2223_v19, 16 }
  0x15   : > { %v2078_v13 = vld [vmem:[%s2192_s27 + $0xb8] ss:$16 sps:$4 sm:$0xff]   ;;  %1887 = vmatmul.mubr.msk.bf16.vlgmr.msra.gmra.mrb[0].mxu1 %vm246_vm1, %v2077_v11  ;;  %v910_v25 = vshll.u32 %v2223_v19, 16  ;;  %v916_v26 = vshll.u32 %v1737_v20, 16  ;;  %v2234_v27 = vld [vmem:[%s2192_s27 + $0xb0] sm:$0xf] }
  0x16   : > { %v2079_v14 = vld [vmem:[%s2192_s27 + $0x48] ss:$16 sps:$4 sm:$0xff]   ;;  %1895 = vmatpush3.bf16.msra.mxu1 %v361_v6  ;;  %1927 = vmatmul.mubr.msk.bf16.vlgmr.msra.gmra.mrb[0].mxu0 %vm246_vm1, %v2078_v13  ;;  %v1740_v28 = vld [vmem:[%s2192_s27 + $0xb4] sm:$0x1]  ;;  %v895_v29 = vrot.slane %v893_v21, 4  ;;  %v898_v30 = vrot.slane %v896_v22, 5 }
  0x17   : > { %1935 = vmatpush3.bf16.msra.mxu0 %v1031_v7  ;;  %1890 = vmatprep.mubr.msk.bf16.mxu1 %vm246_vm1, %v2079_v14  ;;  %v2080_v16 = vld [vmem:[%s2192_s27 + $0x68] ss:$16 sps:$4 sm:$0xff]   ;;  %v904_v31 = vrot.slane %v902_v23, 5  ;;  %v909_v32 = vrot.slane %v907_v24, 4  ;;  %v2238_v33 = vld [vmem:[%s2192_s27 + $0xc0] sm:$0xf] }
  0x18   : > { %2047 = vmatprep.subr.msk.bf16.mxu0 %vm259_vm0, %v1808_v9  ;;  %2042 = vmatprep.subr.msk.bf16.mxu1 %vm259_vm0, %v2206_v12  ;;  %v912_v34 = vrot.slane %v910_v25, 5  ;;  %v918_v35 = vrot.slane %v916_v26, 5  ;;  %v1743_v36 = vld [vmem:[%s2192_s27 + $0xc4] sm:$0x1]  ;;  %v921_v37 = vshrl.u32 %v2234_v27, 16  ;;  %v924_v38 = vshll.u32 %v2234_v27, 16 }
  0x19   : > { %v899_v39 = vor.u32 %v898_v30, %v895_v29  ;;  %v930_v40 = vshll.u32 %v1740_v28, 16  ;;  %v935_v41 = vshrl.u32 %v2238_v33, 16  ;;  %v938_v42 = vshll.u32 %v2238_v33, 16  ;;  %v199_v43 = vld [vmem:[%s2192_s27] sm:$0xf] }
  0x1a   : > { %v913_v45 = vor.u32 %v912_v34, %v909_v32  ;;  %v923_v46 = vrot.slane %v921_v37, 4  ;;  %v926_v47 = vrot.slane %v924_v38, 5  ;;  %v944_v48 = vshll.u32 %v1743_v36, 16  ;;  %v202_v49 = vld [vmem:[%s2192_s27 + $0x10] sm:$0xf] }
  0x1b   : > { %v900_v50 = vrot.slane %v899_v39, 4  ;;  %v932_v51 = vrot.slane %v930_v40, 5  ;;  %v937_v52 = vrot.slane %v935_v41, 4  ;;  %v940_v53 = vrot.slane %v938_v42, 5  ;;  %v2270_v2 = vld [vmem:[%s2192_s27 + $0x20] sm:$0xf] }
  0x1c   : > { %v914_v55 = vrot.slane %v913_v45, 4  ;;  %v927_v56 = vor.u32 %v926_v47, %v923_v46  ;;  %v946_v57 = vrot.slane %v944_v48, 5  ;;  %v1716_v58 = vcombine.low %v199_v43, %v202_v49  ;;  %v2273_v4 = vld [vmem:[%s2192_s27 + $0x30] sm:$0xf]  ;;  %v1746_v20 = vld [vmem:[%s2192_s27 + $0xd4] sm:$0x1] }
  0x1d   : > { %1891 = vmatmul.mubr.msk.bf16.gmra.mrb[4].mxu1 %vm246_vm1, %v2080_v16  ;;  %v905_v61 = vsel %vm2249_vm4, %v900_v50, %v904_v31  ;;  %v941_v62 = vor.u32 %v940_v53, %v937_v52  ;;  %v432_v63 = vshrl.u32 %v199_v43, 16  ;;  %v435_v0 = vshll.u32 %v199_v43, 16  ;;  %v2281_v13 = vld [vmem:[%s2192_s27 + $0xd0] sm:$0xf]  ;;  %v2293_v21 = vld [vmem:[%s2192_s27 + $0xe0] sm:$0xf] }
  0x1e   : > { %v919_v5 = vsel %vm2249_vm4, %v914_v55, %v918_v35  ;;  %v928_v6 = vrot.slane %v927_v56, 4  ;;  %1896 = vmatprep.mubr.msk.bf16.mxu1 %vm246_vm1, %v1716_v58  ;;  %v446_v7 = vshrl.u32 %v202_v49, 16  ;;  %v449_v8 = vshll.u32 %v202_v49, 16  ;;  %v1749_v28 = vld [vmem:[%s2192_s27 + $0xe4] sm:$0x1] }
  0x1f   : > { %v1776_v9 = vcombine.low %v905_v61, %v919_v5  ;;  %v942_v10 = vrot.slane %v941_v62, 4  ;;  %v570_v11 = vsel %vm259_vm0, %v2206_v12, 0  ;;  %v2285_v14 = vsel %vm259_vm0, %v2257_v54, 0  ;;  %v2318_v34 = vld [vmem:[%s2192_s27 + $0xf0] sm:$0xf] }
  0x20   : > { %v933_v16 = vsel %vm2249_vm4, %v928_v6, %v932_v51  ;;  %v1717_v18 = vcombine.low %v2270_v2, %v2273_v4  ;;  %v2296_v22 = vsel %vm259_vm0, %v1757_v59, 0  ;;  %v2300_v12 = vsel %vm259_vm0, %v2265_v60, 0  ;;  %v1752_v37 = vld [vmem:[%s2192_s27 + $0xf4] sm:$0x1]  ;;  %v2323_v38 = vld [vmem:[%s2192_s27 + $0x100] sm:$0xf] }
  0x21   : > { %1936 = vmatprep.mubr.msk.bf16.mxu0 %vm246_vm1, %v1776_v9  ;;  %v947_v23 = vsel %vm2249_vm4, %v942_v10, %v946_v57  ;;  %v2305_v24 = vrot.slane %v432_v63, 4  ;;  %v2307_v25 = vrot.slane %v435_v0, 5  ;;  %v2309_v26 = vrot.slane %v446_v7, 4  ;;  %v1755_v43 = vld [vmem:[%s2192_s27 + $0x104] sm:$0x1] }
  0x22   : > { %v1777_v29 = vcombine.low %v933_v16, %v947_v23  ;;  %v2312_v30 = vrot.slane %v449_v8, 5  ;;  %v949_v31 = vshrl.u32 %v2281_v13, 16  ;;  %v952_v32 = vshll.u32 %v2281_v13, 16  ;;  %v211_v49 = vld [vmem:[%s2192_s27 + $0x40] sm:$0xf] }
  0x23   : > { %v460_v35 = vshrl.u32 %v2270_v2, 16  ;;  %v958_v36 = vshll.u32 %v1746_v20, 16  ;;  %v463_v39 = vshll.u32 %v2270_v2, 16  ;;  %v963_v42 = vshrl.u32 %v2293_v21, 16  ;;  %v214_v55 = vld [vmem:[%s2192_s27 + $0x50] sm:$0xf] }
  0x24   : > { %1937 = vmatmul.mubr.msk.bf16.vlgmr.msra.gmra.mrb[0].mxu0 %vm246_vm1, %v1777_v29  ;;  %v951_v40 = vrot.slane %v949_v31, 4  ;;  %v954_v41 = vrot.slane %v952_v32, 5  ;;  %v474_v45 = vshrl.u32 %v2273_v4, 16  ;;  %v966_v46 = vshll.u32 %v2293_v21, 16  ;;  %v220_v10 = vld [vmem:[%s2192_s27 + $0x70] sm:$0xf] }
  0x25   : > { %1897 = vmatmul.mubr.msk.bf16.vlgmr.msra.gmra.mrb[0].mxu1 %vm246_vm1, %v1717_v18  ;;  %1945 = vmatpush3.bf16.msra.mxu0 %v2214_v15  ;;  %v972_v47 = vshll.u32 %v1749_v28, 16  ;;  %v977_v48 = vshrl.u32 %v2318_v34, 16  ;;  %v965_v51 = vrot.slane %v963_v42, 4  ;;  %v980_v52 = vshll.u32 %v2318_v34, 16 }
  0x26   : > { %1905 = vmatpush3.bf16.msra.mxu1 %v570_v11  ;;  %v955_v50 = vor.u32 %v954_v41, %v951_v40  ;;  %v986_v53 = vshll.u32 %v1752_v37, 16  ;;  %2048 = vmatprep.subr.msk.bf16.mxu0 %vm259_vm0, %v2257_v54  ;;  %v960_v56 = vrot.slane %v958_v36, 5  ;;  %v968_v15 = vrot.slane %v966_v46, 5  ;;  %v217_v54 = vld [vmem:[%s2192_s27 + $0x60] sm:$0xf] }
  0x27   : > { %2043 = vmatprep.subr.msk.bf16.mxu1 %vm259_vm0, %v1757_v59  ;;  %v979_v57 = vrot.slane %v977_v48, 4  ;;  %v991_v58 = vshrl.u32 %v2323_v38, 16  ;;  %v974_v61 = vrot.slane %v972_v47, 5  ;;  %v982_v62 = vrot.slane %v980_v52, 5  ;;  %v2354_v40 = vld [vmem:[%s2192_s27 + $0x10] sm:$0xf] }
  0x28   : > { %v956_v59 = vrot.slane %v955_v50, 4  ;;  %v994_v63 = vshll.u32 %v2323_v38, 16  ;;  %v969_v0 = vor.u32 %v968_v15, %v965_v51  ;;  %v1000_v5 = vshll.u32 %v1755_v43, 16  ;;  %v200_v15 = vld [vmem:[%s2192_s27 + $0x4] sm:$0x1] }
  0x29   : > { %v993_v2 = vrot.slane %v991_v58, 4  ;;  %v1718_v6 = vcombine.low %v211_v49, %v214_v55  ;;  %v983_v7 = vor.u32 %v982_v62, %v979_v57  ;;  %v988_v8 = vrot.slane %v986_v53, 5 }
  0x2a   : > { %v996_v9 = vrot.slane %v994_v63, 5  ;;  %v2343_v11 = vrot.slane %v460_v35, 4  ;;  %v477_v16 = vshll.u32 %v2273_v4, 16  ;;  %v961_v18 = vsel %vm2249_vm4, %v956_v59, %v960_v56  ;;  %v2357_v4 = vld [vmem:[%s2192_s27 + $0x20] sm:$0xf] }
  0x2b   : > { %v970_v20 = vrot.slane %v969_v0, 4  ;;  %1900 = vmatprep.mubr.msk.bf16.mxu1 %vm246_vm1, %v1718_v6  ;;  %v2349_v23 = vrot.slane %v463_v39, 5  ;;  %v984_v28 = vrot.slane %v983_v7, 4  ;;  %v1002_v31 = vrot.slane %v1000_v5, 5  ;;  %v2368_v56 = vld [vmem:[%s2192_s27 + $0x30] sm:$0xf] }
  0x2c   : > { %v997_v29 = vor.u32 %v996_v9, %v993_v2  ;;  %v488_v36 = vshrl.u32 %v211_v49, 16  ;;  %v491_v37 = vshll.u32 %v211_v49, 16  ;;  %v1719_v35 = vcombine.low %v217_v54, %v220_v10  ;;  %v203_v63 = vld [vmem:[%s2192_s27 + $0x14] sm:$0x1]  ;;  %v206_v0 = vld [vmem:[%s2192_s27 + $0x24] sm:$0x1] }
  0x2d   : > { %v975_v32 = vsel %vm2249_vm4, %v970_v20, %v974_v61  ;;  %v989_v39 = vsel %vm2249_vm4, %v984_v28, %v988_v8  ;;  %v502_v43 = vshrl.u32 %v214_v55, 16  ;;  %v476_v46 = vrot.slane %v474_v45, 4  ;;  %v209_v8 = vld [vmem:[%s2192_s27 + $0x34] sm:$0x1]  ;;  %v2393_v9 = vld [vmem:[%s2192_s27 + $0x50] sm:$0xf] }
  0x2e   : > { %v1778_v41 = vcombine.low %v961_v18, %v975_v32  ;;  %v998_v42 = vrot.slane %v997_v29, 4  ;;  %v505_v47 = vshll.u32 %v214_v55, 16  ;;  %1901 = vmatmul.mubr.msk.bf16.gmra.mrb[4].mxu1 %vm246_vm1, %v1719_v35  ;;  %v516_v48 = vshrl.u32 %v217_v54, 16  ;;  %v2371_v55 = vld [vmem:[%s2192_s27 + $0x40] sm:$0xf] }
  0x2f   : > { %v519_v49 = vshll.u32 %v217_v54, 16  ;;  %v530_v51 = vshrl.u32 %v220_v10, 16  ;;  %v533_v52 = vshll.u32 %v220_v10, 16  ;;  %v1809_v53 = vcombine.low %v2354_v40, %v2357_v4  ;;  %v2396_v54 = vld [vmem:[%s2192_s27 + $0x60] sm:$0xf] }
  0x30   : > { %1940 = vmatprep.mubr.msk.bf16.mxu0 %vm246_vm1, %v1778_v41  ;;  %v1003_v50 = vsel %vm2249_vm4, %v998_v42, %v1002_v31  ;;  %v1758_v57 = vcombine.low %v2219_v17, %v2223_v19  ;;  %v479_v58 = vrot.slane %v477_v16, 5  ;;  %v2376_v59 = vrot.slane %v488_v36, 4 }
  0x31   : > { %v1779_v45 = vcombine.low %v989_v39, %v1003_v50  ;;  %v2378_v61 = vrot.slane %v491_v37, 5  ;;  %v2380_v62 = vrot.slane %v502_v43, 4  ;;  %v2385_v2 = vrot.slane %v505_v47, 5 }
  0x32   : > { %v2387_v5 = vrot.slane %v516_v48, 4  ;;  %v1355_v6 = vshrl.u32 %v2354_v40, 16  ;;  %v1358_v7 = vshll.u32 %v2354_v40, 16  ;;  %v2398_v10 = vrot.slane %v519_v49, 5 }
  0x33   : > { %1941 = vmatmul.mubr.msk.bf16.gmra.mrb[4].mxu0 %vm246_vm1, %v1779_v45  ;;  %v2400_v16 = vrot.slane %v530_v51, 4  ;;  %v2402_v18 = vrot.slane %v533_v52, 5  ;;  %v438_v20 = vor.u32 %v2307_v25, %v2305_v24  ;;  %v1369_v28 = vshrl.u32 %v2357_v4, 16  ;;  %v2433_v45 = vld [vmem:[%s2192_s27 + $0x70] sm:$0xf] }
  0x34   : > { %1946 = vmatprep.mubr.msk.bf16.mxu0 %vm246_vm1, %v1809_v53  ;;  %v1372_v29 = vshll.u32 %v2357_v4, 16  ;;  %v1810_v31 = vcombine.low %v2368_v56, %v2371_v55  ;;  %v441_v32 = vshll.u32 %v200_v15, 16  ;;  %v1383_v36 = vshrl.u32 %v2368_v56, 16  ;;  %v2436_v15 = vld [vmem:[%s2192_s27 + $0x80] sm:$0xf] }
  0x35   : > { %v1386_v37 = vshll.u32 %v2368_v56, 16  ;;  %v439_v35 = vrot.slane %v438_v20, 4  ;;  %v452_v40 = vor.u32 %v2312_v30, %v2309_v26  ;;  %v455_v39 = vshll.u32 %v203_v63, 16 }
  0x36   : > { %v443_v41 = vrot.slane %v441_v32, 5  ;;  %v466_v24 = vor.u32 %v2349_v23, %v2343_v11  ;;  %v469_v25 = vshll.u32 %v206_v0, 16  ;;  %v480_v4 = vor.u32 %v479_v58, %v476_v46 }
  0x37   : > { %v453_v42 = vrot.slane %v452_v40, 4  ;;  %v483_v43 = vshll.u32 %v209_v8, 16  ;;  %v1811_v47 = vcombine.low %v2393_v9, %v2396_v54  ;;  %v457_v49 = vrot.slane %v455_v39, 5  ;;  %v221_v39 = vld [vmem:[%s2192_s27 + $0x74] sm:$0x1] }
  0x38   : > { %v444_v48 = vsel %vm2249_vm4, %v439_v35, %v443_v41  ;;  %v467_v50 = vrot.slane %v466_v24, 4  ;;  %v471_v26 = vrot.slane %v469_v25, 5  ;;  %v1397_v30 = vshrl.u32 %v2371_v55, 16  ;;  %v218_v41 = vld [vmem:[%s2192_s27 + $0x64] sm:$0x1] }
  0x39   : > { %v1400_v51 = vshll.u32 %v2371_v55, 16  ;;  %v481_v11 = vrot.slane %v480_v4, 4  ;;  %v485_v23 = vrot.slane %v483_v43, 5  ;;  %v2423_v46 = vrot.slane %v1355_v6, 4  ;;  %v212_v6 = vld [vmem:[%s2192_s27 + $0x44] sm:$0x1] }
  0x3a   : > { %v2425_v52 = vrot.slane %v1358_v7, 5  ;;  %v458_v53 = vsel %vm2249_vm4, %v453_v42, %v457_v49  ;;  %v472_v56 = vsel %vm2249_vm4, %v467_v50, %v471_v26  ;;  %v2438_v55 = vrot.slane %v1369_v28, 4  ;;  %v215_v7 = vld [vmem:[%s2192_s27 + $0x54] sm:$0x1]  ;;  %v2089_v4 = vld [vmem:[%s2192_s27 + $0x18] ss:$16 sps:$4 sm:$0xff]  }
  0x3b   : > { %1947 = vmatmul.mubr.msk.bf16.vlgmr.msra.gmra.mrb[0].mxu0 %vm246_vm1, %v1810_v31  ;;  %v1725_v58 = vcombine.low %v444_v48, %v458_v53  ;;  %v486_v63 = vsel %vm2249_vm4, %v481_v11, %v485_v23  ;;  %v1411_v0 = vshrl.u32 %v2393_v9, 16  ;;  %v1374_v8 = vrot.slane %v1372_v29, 5 }
  0x3c   : > { %1955 = vmatpush3.bf16.msra.mxu0 %v2285_v14  ;;  %1950 = vmatprep.mubr.msk.bf16.mxu0 %vm246_vm1, %v1811_v47  ;;  %v2447_v20 = vrot.slane %v1383_v36, 4  ;;  %v2449_v31 = vrot.slane %v1386_v37, 5  ;;  %v1726_v28 = vcombine.low %v472_v56, %v486_v63  ;;  %v2453_v14 = vrot.slane %v1397_v30, 4  ;;  %v2093_v63 = vld [vmem:[%s2192_s27 + $0x58] ss:$16 sps:$4 sm:$0xff]  }
  0x3d   : > { %2049 = vmatprep.subr.msk.bf16.mxu0 %vm259_vm0, %v2265_v60  ;;  %v2455_v32 = vrot.slane %v1400_v51, 5  ;;  %1906 = vmatprep.mubr.msk.bf16.mxu1 %vm246_vm1, %v1725_v58  ;;  %v1414_v35 = vshll.u32 %v2393_v9, 16  ;;  %v1812_v29 = vcombine.low %v2433_v45, %v2436_v15  ;;  %v494_v36 = vor.u32 %v2378_v61, %v2376_v59  ;;  %v2090_v58 = vld [vmem:[%s2192_s27 + $0x38] ss:$16 sps:$4 sm:$0xff]  }
  0x3e   : > { %1907 = vmatmul.mubr.msk.bf16.vlgmr.msra.gmra.mrb[0].mxu1 %vm246_vm1, %v1726_v28  ;;  %v497_v37 = vshll.u32 %v212_v6, 16  ;;  %v508_v60 = vor.u32 %v2385_v2, %v2380_v62  ;;  %v511_v40 = vshll.u32 %v215_v7, 16  ;;  %v2469_v24 = vrot.slane %v1411_v0, 4 }
  0x3f   : > { %1915 = vmatpush3.bf16.msra.mxu1 %v2296_v22  ;;  %v1425_v9 = vshrl.u32 %v2396_v54, 16  ;;  %v1428_v25 = vshll.u32 %v2396_v54, 16  ;;  %v1439_v42 = vshrl.u32 %v2433_v45, 16  ;;  %v495_v59 = vrot.slane %v494_v36, 4  ;;  %v1785_v54 = vld [vmem:[%s2192_s27 + $0x14] sm:$0x1] }
  0x40   : > { %v499_v61 = vrot.slane %v497_v37, 5  ;;  %v509_v43 = vrot.slane %v508_v60, 4  ;;  %v513_v62 = vrot.slane %v511_v40, 5  ;;  %2045 = vmatprep.subr.msk.bf16.mxu1 %vm259_vm0, %v2167_v1  ;;  %v522_v22 = vor.u32 %v2398_v10, %v2387_v5  ;;  %v1788_v5 = vld [vmem:[%s2192_s27 + $0x24] sm:$0x1] }
  0x41   : > { %v525_v2 = vshll.u32 %v218_v41, 16  ;;  %v536_v47 = vor.u32 %v2402_v18, %v2400_v16  ;;  %v539_v48 = vshll.u32 %v221_v39, 16  ;;  %v1442_v49 = vshll.u32 %v2433_v45, 16  ;;  %v1794_v60 = vld [vmem:[%s2192_s27 + $0x44] sm:$0x1] }
  0x42   : > { %v1453_v50 = vshrl.u32 %v2436_v15, 16  ;;  %v500_v26 = vsel %vm2249_vm4, %v495_v59, %v499_v61  ;;  %v514_v1 = vsel %vm2249_vm4, %v509_v43, %v513_v62  ;;  %v523_v30 = vrot.slane %v522_v22, 4  ;;  %v1797_v39 = vld [vmem:[%s2192_s27 + $0x54] sm:$0x1]  ;;  %v1800_v59 = vld [vmem:[%s2192_s27 + $0x64] sm:$0x1] }
  0x43   : > { %1951 = vmatmul.mubr.msk.bf16.gmra.mrb[4].mxu0 %vm246_vm1, %v1812_v29  ;;  %v1727_v10 = vcombine.low %v500_v26, %v514_v1  ;;  %v527_v16 = vrot.slane %v525_v2, 5  ;;  %v537_v18 = vrot.slane %v536_v47, 4  ;;  %v1456_v51 = vshll.u32 %v2436_v15, 16  ;;  %v1803_v61 = vld [vmem:[%s2192_s27 + $0x74] sm:$0x1] }
  0x44   : > { %1956 = vmatprep.mubr.msk.bf16.mxu0 %vm246_vm1, %v2089_v4  ;;  %v541_v11 = vrot.slane %v539_v48, 5  ;;  %v1361_v23 = vor.u32 %v2425_v52, %v2423_v46  ;;  %v1364_v53 = vshll.u32 %v1785_v54, 16  ;;  %v1416_v56 = vrot.slane %v1414_v35, 5  ;;  %v1791_v52 = vld [vmem:[%s2192_s27 + $0x34] sm:$0x1] }
  0x45   : > { %1910 = vmatprep.mubr.msk.bf16.mxu1 %vm246_vm1, %v1727_v10  ;;  %v528_v45 = vsel %vm2249_vm4, %v523_v30, %v527_v16  ;;  %v1375_v0 = vor.u32 %v1374_v8, %v2438_v55  ;;  %v1378_v6 = vshll.u32 %v1788_v5, 16  ;;  %v1427_v7 = vrot.slane %v1425_v9, 4 }
  0x46   : > { %v542_v15 = vsel %vm2249_vm4, %v537_v18, %v541_v11  ;;  %v1362_v28 = vrot.slane %v1361_v23, 4  ;;  %v1366_v46 = vrot.slane %v1364_v53, 5  ;;  %v1430_v35 = vrot.slane %v1428_v25, 5 }
  0x47   : > { %v1728_v29 = vcombine.low %v528_v45, %v542_v15  ;;  %v1376_v36 = vrot.slane %v1375_v0, 4  ;;  %v1380_v37 = vrot.slane %v1378_v6, 5  ;;  %v1441_v40 = vrot.slane %v1439_v42, 4  ;;  %v2098_v0 = vld [vmem:[%s2192_s27 + $0xf8] ss:$16 sps:$4 sm:$0xff]  }
  0x48   : > { %v1444_v41 = vrot.slane %v1442_v49, 5  ;;  %v1455_v55 = vrot.slane %v1453_v50, 4  ;;  %v1458_v8 = vrot.slane %v1456_v51, 5  ;;  %v1389_v9 = vor.u32 %v2449_v31, %v2447_v20  ;;  %v1806_v31 = vld [vmem:[%s2192_s27 + $0x84] sm:$0x1] }
  0x49   : > { %1911 = vmatmul.mubr.msk.bf16.gmra.mrb[4].mxu1 %vm246_vm1, %v1728_v29  ;;  %v1392_v4 = vshll.u32 %v1791_v52, 16  ;;  %v1759_v25 = vcombine.low %v2234_v27, %v2238_v33  ;;  %v1367_v42 = vsel %vm2249_vm4, %v1362_v28, %v1366_v46  ;;  %v1403_v43 = vor.u32 %v2455_v32, %v2453_v14  ;;  %v1835_v15 = vld [vmem:[%s2593_s2] ss:$0 sm:$0xff] }
  0x4a   : > { %1916 = vmatprep.mubr.msk.bf16.mxu1 %vm246_vm1, %v1758_v57  ;;  %v1406_v20 = vshll.u32 %v1794_v60, 16  ;;  %v1381_v17 = vsel %vm2249_vm4, %v1376_v36, %v1380_v37  ;;  %v1417_v19 = vor.u32 %v1416_v56, %v2469_v24  ;;  %v1420_v57 = vshll.u32 %v1797_v39, 16 }
  0x4b   : > { %1957 = vmatmul.mubr.msk.bf16.vlgmr.msra.gmra.mrb[0].mxu0 %vm246_vm1, %v2090_v58  ;;  %v1431_v27 = vor.u32 %v1430_v35, %v1427_v7  ;;  %v1434_v33 = vshll.u32 %v1800_v59, 16  ;;  %v1445_v62 = vor.u32 %v1444_v41, %v1441_v40  ;;  %v1448_v22 = vshll.u32 %v1803_v61, 16  ;;  %v2097_v58 = vld [vmem:[%s2192_s27 + $0xd8] ss:$16 sps:$4 sm:$0xff]  }
  0x4c   : > { %1965 = vmatpush3.bf16.msra.mxu0 %v2300_v12  ;;  %1960 = vmatprep.mubr.msk.bf16.mxu0 %vm246_vm1, %v2093_v63  ;;  %v1459_v2 = vor.u32 %v1458_v8, %v1455_v55  ;;  %v1760_v14 = vcombine.low %v2281_v13, %v2293_v21  ;;  %v1390_v32 = vrot.slane %v1389_v9, 4  ;;  %v1394_v47 = vrot.slane %v1392_v4, 5  ;;  %v2094_v12 = vld [vmem:[%s2192_s27 + $0x78] ss:$16 sps:$4 sm:$0xff]  }
  0x4d   : > { %v1462_v48 = vshll.u32 %v1806_v31, 16  ;;  %v1827_v54 = vcombine.low %v1367_v42, %v1381_v17  ;;  %v1446_v49 = vrot.slane %v1445_v62, 4  ;;  %v1450_v50 = vrot.slane %v1448_v22, 5 }
  0x4e   : > { %v1460_v26 = vrot.slane %v1459_v2, 4  ;;  %v1404_v1 = vrot.slane %v1403_v43, 4  ;;  %v1408_v5 = vrot.slane %v1406_v20, 5  ;;  %v1418_v24 = vrot.slane %v1417_v19, 4 }
  0x4f   : > { %v1464_v10 = vrot.slane %v1462_v48, 5  ;;  %v1422_v30 = vrot.slane %v1420_v57, 5  ;;  %v1432_v16 = vrot.slane %v1431_v27, 4  ;;  %v1436_v18 = vrot.slane %v1434_v33, 5 }
  0x50   : > { %v1451_v51 = vsel %vm2249_vm4, %v1446_v49, %v1450_v50  ;;  %v1395_v11 = vsel %vm2249_vm4, %v1390_v32, %v1394_v47  ;;  %v1409_v23 = vsel %vm2249_vm4, %v1404_v1, %v1408_v5  ;;  %v1761_v56 = vcombine.low %v2318_v34, %v2323_v38 }
  0x51   : > { %1917 = vmatmul.mubr.msk.bf16.vlgmr.msra.gmra.mrb[0].mxu1 %vm246_vm1, %v1759_v25  ;;  %v1465_v13 = vsel %vm2249_vm4, %v1460_v26, %v1464_v10  ;;  %v1423_v53 = vsel %vm2249_vm4, %v1418_v24, %v1422_v30  ;;  %v1828_v45 = vcombine.low %v1395_v11, %v1409_v23 }
  0x52   : > { %1975 = vmatpush3.bf16.msra.mxu1 %v2175_v3  ;;  %v1830_v21 = vcombine.low %v1451_v51, %v1465_v13  ;;  %1920 = vmatprep.mubr.msk.bf16.mxu1 %vm246_vm1, %v1760_v14  ;;  %v1437_v3 = vsel %vm2249_vm4, %v1432_v16, %v1436_v18 }
  0x53   : > { %1961 = vmatmul.mubr.msk.bf16.gmra.mrb[4].mxu0 %vm246_vm1, %v2094_v12  ;;  %v1829_v63 = vcombine.low %v1423_v53, %v1437_v3 }
  0x54   : > { %1966 = vmatprep.mubr.msk.bf16.mxu0 %vm246_vm1, %v1827_v54 }
  0x59   : > { %1921 = vmatmul.mubr.msk.bf16.gmra.mrb[4].mxu1 %vm246_vm1, %v1761_v56 }
  0x5a   : > { %1930 = vmatprep.mubr.msk.bf16.mxu1 %vm246_vm1, %v2097_v58 }
  0x5b   : > { %1967 = vmatmul.mubr.msk.bf16.vlgmr.msra.gmra.mrb[0].mxu0 %vm246_vm1, %v1828_v45 }
  0x5c   : > { %1970 = vmatprep.mubr.msk.bf16.mxu0 %vm246_vm1, %v1829_v63 }
  0x63   : > { %1971 = vmatmul.mubr.msk.bf16.gmra.mrb[4].mxu0 %vm246_vm1, %v1830_v21 }
  0x65   : > { %1931 = vmatmul.mubr.msk.bf16.vlgmr.msra.gmra.mrb[4].mxu1 %vm246_vm1, %v2098_v0 }
 0x124   : > { %v1918_v44 = vpop.f32.mrb[0].mxu1 }
 0x125   : > { %v743_v6 = vpop.f32.mrb[1].mxu1 }
 0x126   : > { %v1919_v34 = vpop.f32.mrb[2].mxu1 }
 0x127   : > { %v746_v38 = vpop.f32.mrb[3].mxu1 }
 0x12e   : > { %v1968_v7 = vpop.f32.mrb[0].mxu0 }
 0x12f   : > { %v1976_v28 = vadd.f32 %v1968_v7, %v1918_v44  ;;  %v1529_v46 = vpop.f32.mrb[1].mxu0 }
 0x130   : > { %v1977_v52 = vadd.f32 %v1529_v46, %v743_v6  ;;  %v1969_v35 = vpop.f32.mrb[2].mxu0 }
 0x131   : > { %v1577_v29 = vadd.f32 %v1976_v28, %v1835_v15  ;;  %v1978_v36 = vadd.f32 %v1969_v35, %v1919_v34  ;;  %v1532_v37 = vpop.f32.mrb[3].mxu0 }
 0x132   : > { %v1575_v60 = vadd.f32 %v1977_v52, %v1835_v15  ;;  %v1979_v40 = vadd.f32 %v1532_v37, %v746_v38 }
 0x133   : > { %v1585_v41 = vmax.f32 %v1577_v29, 0.0  ;;  %v1578_v55 = vadd.f32 %v1978_v36, %v1835_v15 }
 0x134   : > { %v1583_v8 = vmax.f32 %v1575_v60, 0.0  ;;  %v1576_v39 = vadd.f32 %v1979_v40, %v1835_v15 }
 0x135   : > { %v1593_v9 = vpack.c.bf16 %v1585_v41, %v1585_v41  ;;  %v1586_v4 = vmax.f32 %v1578_v55, 0.0 }
 0x136   : > { %v1591_v59 = vpack.c.bf16 %v1583_v8, %v1583_v8  ;;  %v1584_v61 = vmax.f32 %v1576_v39, 0.0  ;;  %v1972_v25 = vpop.f32.mrb[4].mxu0 }
 0x137   : > { %1602 = vst.msk [vmem:[%s2564_s20 + $0x8] sm:$0xf] %vm1599_vm5, %v1593_v9  ;;  %v1594_v42 = vpack.c.bf16 %v1586_v4, %v1586_v4  ;;  %v1545_v43 = vpop.f32.mrb[5].mxu0 }
 0x138   : > { %1600 = vst.msk [vmem:[%s2564_s20] sm:$0xf] %vm1599_vm5, %v1591_v59  ;;  %v1592_v20 = vpack.c.bf16 %v1584_v61, %v1584_v61  ;;  %v1973_v31 = vpop.f32.mrb[6].mxu0  ;;  %v1932_v17 = vpop.f32.mrb[4].mxu1 }
 0x139   : > { %1603 = vst.msk [vmem:[%s2564_s20 + $0xc] sm:$0xf] %vm1599_vm5, %v1594_v42  ;;  %v1548_v19 = vpop.f32.mrb[7].mxu0  ;;  %v1980_v57 = vadd.f32 %v1972_v25, %v1932_v17  ;;  %v869_v27 = vpop.f32.mrb[5].mxu1 }
 0x13a   : > { %1601 = vst.msk [vmem:[%s2564_s20 + $0x4] sm:$0xf] %vm1599_vm5, %v1592_v20  ;;  %v1981_v33 = vadd.f32 %v1545_v43, %v869_v27  ;;  %v1933_v62 = vpop.f32.mrb[6].mxu1 }
 0x13b   : > { %v1581_v22 = vadd.f32 %v1980_v57, %v1835_v15  ;;  %v1982_v2 = vadd.f32 %v1973_v31, %v1933_v62  ;;  %v872_v14 = vpop.f32.mrb[7].mxu1 }
 0x13c   : > { %v1579_v32 = vadd.f32 %v1981_v33, %v1835_v15  ;;  %v1983_v47 = vadd.f32 %v1548_v19, %v872_v14 }
 0x13d   : > { %v1589_v48 = vmax.f32 %v1581_v22, 0.0  ;;  %v1582_v12 = vadd.f32 %v1982_v2, %v1835_v15 }
 0x13e   : > { %v1587_v54 = vmax.f32 %v1579_v32, 0.0  ;;  %v1580_v49 = vadd.f32 %v1983_v47, %v1835_v15 }
 0x13f   : > { %v1597_v50 = vpack.c.bf16 %v1589_v48, %v1589_v48  ;;  %v1590_v26 = vmax.f32 %v1582_v12, 0.0 }
 0x140   : > { %v1595_v1 = vpack.c.bf16 %v1587_v54, %v1587_v54  ;;  %v1588_v5 = vmax.f32 %v1580_v49, 0.0 }
 0x141   : > { %1606 = vst.msk [vmem:[%s2564_s20 + $0x18] sm:$0xf] %vm1599_vm5, %v1597_v50  ;;  %v1598_v24 = vpack.c.bf16 %v1590_v26, %v1590_v26 }
 0x142   : > { %1604 = vst.msk [vmem:[%s2564_s20 + $0x10] sm:$0xf] %vm1599_vm5, %v1595_v1  ;;  %v1596_v10 = vpack.c.bf16 %v1588_v5, %v1588_v5 }
 0x143   : > { %1607 = vst.msk [vmem:[%s2564_s20 + $0x1c] sm:$0xf] %vm1599_vm5, %v1598_v24 }
 0x144   : > { %1605 = vst.msk [vmem:[%s2564_s20 + $0x14] sm:$0xf] %vm1599_vm5, %v1596_v10 }
 0x145 PF: > { %s13_s14 = sadd.s32 1, %s2121_s14   ;;  %s2597_s12 = smov %s2117_s13 }
 0x146   : > { %p10_p5 = scmp.ge.s32.totalorder %s13_s14, 4   ;;  %s2598_s13 = smov %s2600_s15 }
 0x148   :  { %12 = sbr.rel (!%p10_p5) target bundleno = 2 (0x2), region = 73 }

</bundles_post_ra>
